<compile_context>
chip_gen: v7x
topology: tpu7x:2x2x1
jax: 0.10.0
libtpu: 0.0.40
codegen_flags: <defaults>
</compile_context>

<pallas_src>
import functools

import jax
import jax.numpy as jnp
from jax.experimental import pallas as pl
from jax.experimental.pallas import tpu as pltpu


# ------------------------------ Pallas kernels ------------------------------ #
def _direct_conv_kernel(x_ref, w_ref, shift_ref, o_ref):
    """Direct conv (stride 1): full k*k reduction for TH output rows per step.

    x_ref:     (1, TH + k - 1, Wp, C1)  bf16  rolling input-row window
    w_ref:     (k, k, C1, C2p)          bf16  VMEM-resident, BN scale folded in
    shift_ref: (1, C2p)                 f32   folded BN shift (resident)
    o_ref:     (1, TH, Wo, C2p)         bf16
    """
    kh_n, kw_n, c1, c2p = w_ref.shape
    th, wo = o_ref.shape[1], o_ref.shape[2]

    acc = jnp.zeros((th * wo, c2p), jnp.float32)
    # k*k accumulating dots of K = C1 each (no im2col concat copy per step); the MXU
    # sees M = TH*Wo rows per dot, accumulation stays in f32.
    for kh in range(kh_n):
        for kw in range(kw_n):
            patch = x_ref[0, kh:kh + th, kw:kw + wo, :]          # (TH, Wo, C1)
            acc += jnp.dot(patch.reshape(th * wo, c1), w_ref[kh, kw],
                           preferred_element_type=jnp.float32)

    y = acc + shift_ref[...]                                     # BN shift (f32)
    y = y * jax.nn.sigmoid(y)                                    # SiLU
    o_ref[0] = y.reshape(th, wo, c2p).astype(o_ref.dtype)


def _gemm_bn_silu_kernel(p_ref, w_ref, shift_ref, o_ref, acc_ref):
    """im2col GEMM path: K-tiled matmul + BN shift + SiLU, f32 accumulator."""
    kb = pl.program_id(1)

    @pl.when(kb == 0)
    def _init():
        acc_ref[...] = jnp.zeros_like(acc_ref)

    acc_ref[...] += jnp.dot(p_ref[...], w_ref[...],
                            preferred_element_type=jnp.float32)

    @pl.when(kb == pl.num_programs(1) - 1)
    def _finalize():
        y = acc_ref[...] + shift_ref[...]
        o_ref[...] = (y * jax.nn.sigmoid(y)).astype(o_ref.dtype)


# -------------------------------- helpers ------------------------------------ #
def _autopad(k, p=None):
    if p is None:
        p = k // 2 if isinstance(k, int) else [x // 2 for x in k]
    return p


def _round_up(x, m):
    return ((x + m - 1) // m) * m


def _fold_bn(weight, gamma, beta, run_mean, run_var, eps, c2p):
    """Fold eval-mode BN into a per-channel weight scale (bf16) and an f32 shift."""
    c2 = weight.shape[0]
    inv = gamma * jax.lax.rsqrt(run_var + eps)                   # (C2,)
    shift = beta - run_mean * inv                                # (C2,)
    w_t = jnp.transpose(weight, (2, 3, 1, 0)) * inv              # (k, k, C1, C2) f32
    if c2p != c2:
        w_t = jnp.pad(w_t, ((0, 0),) * 3 + ((0, c2p - c2),))
        shift = jnp.pad(shift, (0, c2p - c2))
    return w_t.astype(jnp.bfloat16), shift.reshape(1, c2p).astype(jnp.float32)


# ------------------------------ direct path ---------------------------------- #
@functools.partial(jax.jit, static_argnames=("k", "p", "th", "c2p", "channels_last"))
def _conv_direct_s1(x, weight, gamma, beta, run_mean, run_var, eps,
                    *, k, p, th, c2p, channels_last):
    N, c1, H, W = x.shape
    c2 = weight.shape[0]
    w_t, shift = _fold_bn(weight, gamma, beta, run_mean, run_var, eps, c2p)

    x_pad = jnp.pad(jnp.transpose(x, (0, 2, 3, 1)),
                    ((0, 0), (p, p), (p, p), (0, 0))).astype(jnp.bfloat16)
    Hp, Wp = H + 2 * p, W + 2 * p
    Ho, Wo = Hp - k + 1, Wp - k + 1
    win = th + k - 1                      # rolling input-row window per grid step

    out = pl.pallas_call(
        _direct_conv_kernel,
        out_shape=jax.ShapeDtypeStruct((N, Ho, Wo, c2p), jnp.bfloat16),
        grid_spec=pltpu.PrefetchScalarGridSpec(
            num_scalar_prefetch=0,
            grid=(N, Ho // th),
            in_specs=[
                # Overlapping (TH + k - 1)-row windows -> element-indexed H dim.
                pl.BlockSpec((1, pl.Element(win), Wp, c1),
                             lambda n, hb: (n, hb * th, 0, 0)),
                # Constant block index -> weights DMA'd once, kept VMEM-resident.
                pl.BlockSpec((k, k, c1, c2p), lambda n, hb: (0, 0, 0, 0)),
                pl.BlockSpec((1, c2p), lambda n, hb: (0, 0)),
            ],
            out_specs=pl.BlockSpec((1, th, Wo, c2p), lambda n, hb: (n, hb, 0, 0)),
        ),
        compiler_params=pltpu.CompilerParams(
            dimension_semantics=("parallel", "parallel"),
            vmem_limit_bytes=48 * 1024 * 1024),
    )(x_pad, w_t, shift)

    if channels_last:                                   # NHWC, bf16, no epilogue
        return out if c2p == c2 else out[..., :c2]
    if c2p != c2:
        out = out[..., :c2]
    return jnp.transpose(out, (0, 3, 1, 2)).astype(x.dtype)      # NCHW, module dtype


# ---------------------------- im2col GEMM path -------------------------------- #
def _fused_matmul(patches, w_mat, shift, *, tm=512, tk_max=1024):
    """(M, K) bf16 x (K, C2p) bf16 -> BN shift -> SiLU -> (M, C2p) bf16, K-tiled."""
    M, K = patches.shape
    c2p = w_mat.shape[1]

    K_pad = _round_up(K, 128)                 # lane-aligned contraction (zero pad)
    if K_pad != K:
        patches = jnp.pad(patches, ((0, 0), (0, K_pad - K)))
        w_mat = jnp.pad(w_mat, ((0, K_pad - K), (0, 0)))
    tk = K_pad
    if K_pad > tk_max:                        # tile K so blocks stay VMEM-friendly
        tk = next(c for c in range(tk_max, 0, -128) if K_pad % c == 0)

    tm = min(tm, _round_up(M, 8))
    M_pad = _round_up(M, tm)
    if M_pad != M:
        patches = jnp.pad(patches, ((0, M_pad - M), (0, 0)))

    out = pl.pallas_call(
        _gemm_bn_silu_kernel,
        out_shape=jax.ShapeDtypeStruct((M_pad, c2p), jnp.bfloat16),
        grid_spec=pltpu.PrefetchScalarGridSpec(
            num_scalar_prefetch=0,
            grid=(M_pad // tm, K_pad // tk),
            in_specs=[
                pl.BlockSpec((tm, tk), lambda i, kb: (i, kb)),
                pl.BlockSpec((tk, c2p), lambda i, kb: (kb, 0)),
                pl.BlockSpec((1, c2p), lambda i, kb: (0, 0)),
            ],
            out_specs=pl.BlockSpec((tm, c2p), lambda i, kb: (i, 0)),
            scratch_shapes=[pltpu.VMEM((tm, c2p), jnp.float32)],
        ),
        compiler_params=pltpu.CompilerParams(
            dimension_semantics=("parallel", "arbitrary"),
            vmem_limit_bytes=48 * 1024 * 1024),
    )(patches, w_mat, shift)
    return out[:M]


@functools.partial(jax.jit, static_argnames=("k", "s", "p", "c2p", "channels_last"))
def _conv_im2col(x, weight, gamma, beta, run_mean, run_var, eps,
                 *, k, s, p, c2p, channels_last):
    N, c1, H, W = x.shape
    c2 = weight.shape[0]
    w_t, shift = _fold_bn(weight, gamma, beta, run_mean, run_var, eps, c2p)

    x_pad = jnp.pad(jnp.transpose(x, (0, 2, 3, 1)),
                    ((0, 0), (p, p), (p, p), (0, 0))).astype(jnp.bfloat16)
    Hp, Wp = H + 2 * p, W + 2 * p
    Ho, Wo = (Hp - k) // s + 1, (Wp - k) // s + 1

    # im2col in the wrapper (strided slices + concat), GEMM + BN + SiLU in Pallas.
    cols = [x_pad[:, kh:kh + s * Ho:s, kw:kw + s * Wo:s, :]
            for kh in range(k) for kw in range(k)]
    patches = jnp.concatenate(cols, axis=-1).reshape(N * Ho * Wo, k * k * c1)
    w_mat = w_t.reshape(k * k * c1, c2p)

    out = _fused_matmul(patches, w_mat, shift)            # (M, C2p) bf16
    if channels_last:
        out = out if c2p == c2 else out[:, :c2]
        return out.reshape(N, Ho, Wo, -1)
    out = out[:, :c2].reshape(N, Ho, Wo, c2)
    return jnp.transpose(out, (0, 3, 1, 2)).astype(x.dtype)


# -------------------------------- dispatcher ---------------------------------- #
_MIN_C1_DIRECT = 16               # small-channel stems under-fill MXU lanes -> GEMM
_TH_MAX = 8                       # output rows per grid step on the direct path
_VMEM_BUDGET = 20 * 1024 * 1024   # conservative working set; fits v7x 64 MiB VMEM


def _pick_th(ho, wo, wp, c1, c2p, k):
    """Largest divisor of Ho (<= _TH_MAX) whose working set fits the VMEM budget."""
    for th in range(min(_TH_MAX, ho), 0, -1):
        if ho % th:
            continue
        est = (2 * (th + k - 1) * wp * c1 * 2     # double-buffered bf16 input window
               + 2 * th * wo * c2p * 2            # double-buffered bf16 output block
               + th * wo * c2p * 4                # f32 accumulator
               + k * k * c1 * c2p * 2)            # resident bf16 weights
        if est <= _VMEM_BUDGET:
            return th
    return 1


def conv_bn_silu(x, weight, gamma, beta, run_mean, run_var, *,
                 k, s=1, p=None, eps=1e-5, channels_last=False):
    """SiLU(BatchNorm2d(Conv2d(x))) -- eval-mode BN, bias=False, groups=1.

    x: (N, C1, H, W) NCHW (PyTorch layout);  weight: (C2, C1, k, k).
    Returns NCHW in x.dtype, or NHWC bf16 (padded-C2 aware) if channels_last=True.
    """
    assert isinstance(k, int), "only square int kernels are supported"
    p = _autopad(k, p)
    N, c1, H, W = x.shape
    c2 = weight.shape[0]
    Hp, Wp = H + 2 * p, W + 2 * p
    Ho, Wo = (Hp - k) // s + 1, (Wp - k) // s + 1
    # Lane-dense output channels; 256-multiples feed the 256-wide v6e/v7x MXU.
    c2p = _round_up(c2, 256 if c2 >= 256 else 128)

    if s == 1 and c1 >= _MIN_C1_DIRECT:
        th = _pick_th(Ho, Wo, Wp, c1, c2p, k)
        try:
            return _conv_direct_s1(x, weight, gamma, beta, run_mean, run_var, eps,
                                   k=k, p=p, th=th, c2p=c2p,
                                   channels_last=channels_last)
        except Exception:
            pass  # element-indexed row windows unavailable -> im2col GEMM fallback
    return _conv_im2col(x, weight, gamma, beta, run_mean, run_var, eps,
                        k=k, s=s, p=p, c2p=c2p, channels_last=channels_last)


# ---------------------------- pure-JAX reference ------------------------------ #
def _reference(x_nchw, weight, gamma, beta, run_mean, run_var, *, k, s, p, eps=1e-5):
    y = jax.lax.conv_general_dilated(
        x_nchw, weight, window_strides=(s, s), padding=[(p, p), (p, p)],
        dimension_numbers=("NCHW", "OIHW", "NCHW"))
    scale = (gamma / jnp.sqrt(run_var + eps)).reshape(1, -1, 1, 1)
    shift = (beta - run_mean * gamma / jnp.sqrt(run_var + eps)).reshape(1, -1, 1, 1)
    y = y * scale + shift
    return y * jax.nn.sigmoid(y)


# ------------------------------------ main ------------------------------------ #
def _run_case(key, c1, c2, k, s, N=2, H=16, W=16):
    kx, kw_, kg, kb, km, kv = jax.random.split(key, 6)
    x = jax.random.normal(kx, (N, c1, H, W), dtype=jnp.float32)
    weight = 0.1 * jax.random.normal(kw_, (c2, c1, k, k), dtype=jnp.float32)
    gamma = 1.0 + 0.1 * jax.random.normal(kg, (c2,), dtype=jnp.float32)
    beta = 0.1 * jax.random.normal(kb, (c2,), dtype=jnp.float32)
    run_mean = 0.1 * jax.random.normal(km, (c2,), dtype=jnp.float32)
    run_var = 1.0 + 0.1 * jnp.abs(jax.random.normal(kv, (c2,), dtype=jnp.float32))
    p = _autopad(k, None)

    out = conv_bn_silu(x, weight, gamma, beta, run_mean, run_var, k=k, s=s, p=p)
    out = jax.block_until_ready(out)
    ref = _reference(x, weight, gamma, beta, run_mean, run_var, k=k, s=s, p=p)
    assert out.shape == ref.shape, (out.shape, ref.shape)
    err = float(jnp.max(jnp.abs(out - ref)))
    tol = 3e-2 * max(1.0, float(jnp.max(jnp.abs(ref))))   # bf16 operands, f32 accum
    assert err < tol, (c1, c2, k, s, err, tol)


if __name__ == "__main__":
    keys = jax.random.split(jax.random.PRNGKey(0), 4)
    _run_case(keys[0], 32, 64, 3, 1)   # direct row-window kernel (c1 >= gate, s == 1)
    _run_case(keys[1], 32, 64, 1, 1)   # direct path, 1x1 conv
    _run_case(keys[2], 4, 8, 3, 1)     # small-channel stem -> im2col GEMM path
    _run_case(keys[3], 32, 64, 3, 2)   # stride 2 -> im2col GEMM path
    print("KERNEL_OK")
</pallas_src>

<mosaic_0001>
module attributes {stable_mosaic.version = 11 : i64} {
  func.func @_gemm_bn_silu_kernel(%arg0: i32, %arg1: i32, %arg2: memref<512x384xbf16, #tpu.memory_space<vmem>>, %arg3: memref<384x128xbf16, #tpu.memory_space<vmem>>, %arg4: memref<1x128xf32, #tpu.memory_space<vmem>>, %arg5: memref<512x128xbf16, #tpu.memory_space<vmem>>, %arg6: memref<512x128xf32, #tpu.memory_space<vmem>>) attributes {dimension_semantics = [#tpu.dimension_semantics<parallel>, #tpu.dimension_semantics<arbitrary>], iteration_bounds = array<i64: 1, 1>, scalar_prefetch = 0 : i64, scratch_operands = 1 : i64, tpu.core_type = #tpu.core_type<tc>, window_params = [{transform_indices = @transform_0, window_bounds = array<i64: 512, 384>}, {transform_indices = @transform_1, window_bounds = array<i64: 384, 128>}, {pipeline_mode = #tpu.pipeline_mode<synchronous>, transform_indices = @transform_2, window_bounds = array<i64: 1, 128>}, {transform_indices = @transform_3, window_bounds = array<i64: 512, 128>}]} {
    %c0_i32 = arith.constant 0 : i32
    %0 = arith.cmpi eq, %arg1, %c0_i32 : i32
    %1 = arith.extui %0 : i1 to i32
    %c0_i32_0 = arith.constant 0 : i32
    %2 = arith.cmpi ne, %1, %c0_i32_0 : i32
    scf.if %2 {
      %cst_10 = arith.constant 0.000000e+00 : f32
      %12 = vector.broadcast %cst_10 : f32 to vector<512x128xf32>
      %c0_11 = arith.constant 0 : index
      %c0_12 = arith.constant 0 : index
      %13 = vector.load %arg6[%c0_11, %c0_12] : memref<512x128xf32, #tpu.memory_space<vmem>>, vector<512x128xf32>
      tpu.vector_store %arg6[%c0_11, %c0_12], %12 {strides = array<i32>} : memref<512x128xf32, #tpu.memory_space<vmem>>, vector<512x128xf32>,
    } else {
    }
    %c0 = arith.constant 0 : index
    %c0_1 = arith.constant 0 : index
    %3 = vector.load %arg6[%c0, %c0_1] : memref<512x128xf32, #tpu.memory_space<vmem>>, vector<512x128xf32>
    %c0_2 = arith.constant 0 : index
    %c0_3 = arith.constant 0 : index
    %4 = vector.load %arg2[%c0_2, %c0_3] : memref<512x384xbf16, #tpu.memory_space<vmem>>, vector<512x384xbf16>
    %c0_4 = arith.constant 0 : index
    %c0_5 = arith.constant 0 : index
    %5 = vector.load %arg3[%c0_4, %c0_5] : memref<384x128xbf16, #tpu.memory_space<vmem>>, vector<384x128xbf16>
    %cst = arith.constant dense<0.000000e+00> : vector<512x128xf32>
    %6 = tpu.matmul %4, %5, %cst {dimension_numbers = #tpu.dot_dimension_numbers<[1], [0], [0], [1], [0, 0, 1, 1], [], []>} : vector<512x384xbf16>, vector<384x128xbf16>, vector<512x128xf32> -> vector<512x128xf32>
    %7 = arith.addf %3, %6 : vector<512x128xf32>
    %c0_6 = arith.constant 0 : index
    %c0_7 = arith.constant 0 : index
    %8 = vector.load %arg6[%c0_6, %c0_7] : memref<512x128xf32, #tpu.memory_space<vmem>>, vector<512x128xf32>
    tpu.vector_store %arg6[%c0_6, %c0_7], %7 {strides = array<i32>} : memref<512x128xf32, #tpu.memory_space<vmem>>, vector<512x128xf32>,
    %c0_i32_8 = arith.constant 0 : i32
    %9 = arith.cmpi eq, %arg1, %c0_i32_8 : i32
    %10 = arith.extui %9 : i1 to i32
    %c0_i32_9 = arith.constant 0 : i32
    %11 = arith.cmpi ne, %10, %c0_i32_9 : i32
    scf.if %11 {
      %c0_10 = arith.constant 0 : index
      %c0_11 = arith.constant 0 : index
      %12 = vector.load %arg6[%c0_10, %c0_11] : memref<512x128xf32, #tpu.memory_space<vmem>>, vector<512x128xf32>
      %c0_12 = arith.constant 0 : index
      %c0_13 = arith.constant 0 : index
      %13 = vector.load %arg4[%c0_12, %c0_13] : memref<1x128xf32, #tpu.memory_space<vmem>>, vector<1x128xf32>
      %14 = vector.broadcast %13 : vector<1x128xf32> to vector<512x128xf32>
      %15 = arith.addf %12, %14 : vector<512x128xf32>
      %16 = arith.negf %15 : vector<512x128xf32>
      %17 = math.exp %16 : vector<512x128xf32>
      %cst_14 = arith.constant 1.000000e+00 : f32
      %18 = vector.broadcast %cst_14 : f32 to vector<512x128xf32>
      %19 = arith.addf %18, %17 : vector<512x128xf32>
      %20 = arith.divf %18, %19 : vector<512x128xf32>
      %21 = arith.mulf %15, %20 : vector<512x128xf32>
      %22 = arith.truncf %21 : vector<512x128xf32> to vector<512x128xbf16>
      %c0_15 = arith.constant 0 : index
      %c0_16 = arith.constant 0 : index
      %23 = vector.load %arg5[%c0_15, %c0_16] : memref<512x128xbf16, #tpu.memory_space<vmem>>, vector<512x128xbf16>
      tpu.vector_store %arg5[%c0_15, %c0_16], %22 {strides = array<i32>} : memref<512x128xbf16, #tpu.memory_space<vmem>>, vector<512x128xbf16>,
    } else {
    }
    return
  }
  func.func @transform_0(%arg0: i32, %arg1: i32) -> (i32, i32) {
    %c0_i32 = arith.constant 0 : i32
    return %arg0, %arg1 : i32, i32
  }
  func.func @transform_1(%arg0: i32, %arg1: i32) -> (i32, i32) {
    %c0_i32 = arith.constant 0 : i32
    %c0_i32_0 = arith.constant 0 : i32
    return %arg1, %c0_i32 : i32, i32
  }
  func.func @transform_2(%arg0: i32, %arg1: i32) -> (i32, i32) {
    %c0_i32 = arith.constant 0 : i32
    %c0_i32_0 = arith.constant 0 : i32
    %c0_i32_1 = arith.constant 0 : i32
    return %c0_i32, %c0_i32_0 : i32, i32
  }
  func.func @transform_3(%arg0: i32, %arg1: i32) -> (i32, i32) {
    %c0_i32 = arith.constant 0 : i32
    %c0_i32_0 = arith.constant 0 : i32
    return %arg0, %c0_i32 : i32, i32
  }
}

</mosaic_0001>

<bundles_post_ra>
// kernel: _conv_im2col.1
= control target key start
LH: loop header
LB: loop body
LE: loop exit
PB: predicated region body
PF: predicated region fallthrough
CT: control target
= control target key end

     0   :  { %v3661_v0 = vmov 0   ;;  %s4656_s1 = inlined_call_operand.vmem [shape: bf16[384,128], index: 1, kind: input, shape index: {}]   ;;  %s4657_s0 = inlined_call_operand.vmem [shape: bf16[512,384], index: 0, kind: input, shape index: {}]   ;;  %s4658_s2 = inlined_call_operand.vmem [shape: f32[1,128], index: 2, kind: input, shape index: {}]   ;;  %s4659_s3 = inlined_call_operand.vmem [shape: bf16[512,128], index: 3, kind: output, shape index: {}]  }
   0x1   :  { %979 = vmatprep.subr.bf16.mxu0 %v3661_v0  ;;  %3219 = vmatprep.subr.bf16.mxu1 %v3661_v0  ;;  %v3252_v1 = vld [vmem:[%s4656_s1] sm:$0xff]   ;;  %v3253_v2 = vld [vmem:[%s4656_s1 + $0x8] sm:$0xff]   ;;  %v3254_v3 = vld [vmem:[%s4656_s1 + $0x10] sm:$0xff]  }
   0x2   :  { %980 = vmatpush1.bf16.msra.mxu0 %v3252_v1  ;;  %3235 = vmatpush1.bf16.msra.mxu1 %v3252_v1  ;;  %v3255_v4 = vld [vmem:[%s4656_s1 + $0x18] sm:$0xff]   ;;  %v3256_v5 = vld [vmem:[%s4656_s1 + $0x20] sm:$0xff]   ;;  %v3257_v7 = vld [vmem:[%s4656_s1 + $0x28] sm:$0xff]  }
   0x3   :  { %981 = vmatprep.subr.bf16.mxu0 %v3661_v0  ;;  %3220 = vmatprep.subr.bf16.mxu1 %v3661_v0  ;;  %v3270_v6 = vld [vmem:[%s4657_s0 + $0x4] ss:$12 sps:$4 sm:$0xff]   ;;  %v3259_v10 = vld [vmem:[%s4656_s1 + $0x38] sm:$0xff]   ;;  %v3261_v12 = vld [vmem:[%s4656_s1 + $0x48] sm:$0xff]  }
   0x4   :  { %v3273_v8 = vld [vmem:[%s4657_s0 + $0x244] ss:$12 sps:$4 sm:$0xff]   ;;  %1011 = vmatprep.mubr.bf16.mxu0 %v3270_v6  ;;  %v3263_v14 = vld [vmem:[%s4656_s1 + $0x58] sm:$0xff]   ;;  %v3265_v16 = vld [vmem:[%s4656_s1 + $0x68] sm:$0xff]  }
   0x5   :  { %1203 = vmatprep.mubr.bf16.mxu1 %v3273_v8  ;;  %v3258_v9 = vld [vmem:[%s4656_s1 + $0x30] sm:$0xff]   ;;  %v3260_v11 = vld [vmem:[%s4656_s1 + $0x40] sm:$0xff]   ;;  %v3267_v18 = vld [vmem:[%s4656_s1 + $0x78] sm:$0xff]  }
   0x6   :  { %982 = vmatpush1.bf16.msra.mxu0 %v3253_v2  ;;  %3236 = vmatpush1.bf16.msra.mxu1 %v3253_v2  ;;  %v3262_v13 = vld [vmem:[%s4656_s1 + $0x50] sm:$0xff]   ;;  %v3264_v15 = vld [vmem:[%s4656_s1 + $0x60] sm:$0xff]   ;;  %v3275_v22 = vld [vmem:[%s4657_s0 + $0x1c] ss:$12 sps:$4 sm:$0xff]  }
   0x7   :  { %983 = vmatprep.subr.bf16.mxu0 %v3661_v0  ;;  %3221 = vmatprep.subr.bf16.mxu1 %v3661_v0  ;;  %v3266_v17 = vld [vmem:[%s4656_s1 + $0x70] sm:$0xff]   ;;  %v3274_v19 = vld [vmem:[%s4656_s1 + $0x80] sm:$0xff]   ;;  %v3277_v23 = vld [vmem:[%s4657_s0 + $0x25c] ss:$12 sps:$4 sm:$0xff]  }
   0x8   :  { %v3268_v20 = vld [vmem:[%s4657_s0] ss:$12 sps:$4 sm:$0xff]   ;;  %v3288_v25 = vld [vmem:[%s4656_s1 + $0x90] sm:$0xff]   ;;  %v3279_v26 = vld [vmem:[%s4657_s0 + $0x18] ss:$12 sps:$4 sm:$0xff]  }
   0x9   :  { %v3271_v21 = vld [vmem:[%s4657_s0 + $0x240] ss:$12 sps:$4 sm:$0xff]   ;;  %v3280_v27 = vld [vmem:[%s4657_s0 + $0x258] ss:$12 sps:$4 sm:$0xff]   ;;  %v3286_v31 = vld [vmem:[%s4657_s0 + $0x30] ss:$12 sps:$4 sm:$0xff]  }
   0xa   :  { %984 = vmatpush1.bf16.msra.mxu0 %v3254_v3  ;;  %3237 = vmatpush1.bf16.msra.mxu1 %v3254_v3  ;;  %v3281_v24 = vld [vmem:[%s4656_s1 + $0x88] sm:$0xff]   ;;  %v3282_v28 = vld [vmem:[%s4657_s0 + $0x34] ss:$12 sps:$4 sm:$0xff]   ;;  %v3295_v30 = vld [vmem:[%s4656_s1 + $0x98] sm:$0xff]  }
   0xb   :  { %985 = vmatprep.subr.bf16.mxu0 %v3661_v0  ;;  %3222 = vmatprep.subr.bf16.mxu1 %v3661_v0  ;;  %v3284_v29 = vld [vmem:[%s4657_s0 + $0x274] ss:$12 sps:$4 sm:$0xff]   ;;  %v3287_v33 = vld [vmem:[%s4657_s0 + $0x270] ss:$12 sps:$4 sm:$0xff]   ;;  %v3289_v34 = vld [vmem:[%s4657_s0 + $0x4c] ss:$12 sps:$4 sm:$0xff]  }
   0xc   :  { %v3302_v32 = vld [vmem:[%s4656_s1 + $0xa0] sm:$0xff]   ;;  %v3291_v35 = vld [vmem:[%s4657_s0 + $0x28c] ss:$12 sps:$4 sm:$0xff]   ;;  %v3293_v37 = vld [vmem:[%s4657_s0 + $0x48] ss:$12 sps:$4 sm:$0xff]  }
   0xd   :  { %v3309_v36 = vld [vmem:[%s4656_s1 + $0xa8] sm:$0xff]   ;;  %v3296_v39 = vld [vmem:[%s4657_s0 + $0x64] ss:$12 sps:$4 sm:$0xff]   ;;  %v3323_v42 = vld [vmem:[%s4656_s1 + $0xb8] sm:$0xff]  }
   0xe   :  { %986 = vmatpush1.bf16.msra.mxu0 %v3255_v4  ;;  %3238 = vmatpush1.bf16.msra.mxu1 %v3255_v4  ;;  %v3294_v38 = vld [vmem:[%s4657_s0 + $0x288] ss:$12 sps:$4 sm:$0xff]   ;;  %v3298_v40 = vld [vmem:[%s4657_s0 + $0x2a4] ss:$12 sps:$4 sm:$0xff]   ;;  %v3300_v43 = vld [vmem:[%s4657_s0 + $0x60] ss:$12 sps:$4 sm:$0xff]  }
   0xf   :  { %987 = vmatprep.subr.bf16.mxu0 %v3661_v0  ;;  %3223 = vmatprep.subr.bf16.mxu1 %v3661_v0  ;;  %v3316_v41 = vld [vmem:[%s4656_s1 + $0xb0] sm:$0xff]   ;;  %v3301_v44 = vld [vmem:[%s4657_s0 + $0x2a0] ss:$12 sps:$4 sm:$0xff]   ;;  %v3303_v45 = vld [vmem:[%s4657_s0 + $0x7c] ss:$12 sps:$4 sm:$0xff]  }
  0x10   :  { %v3305_v46 = vld [vmem:[%s4657_s0 + $0x2bc] ss:$12 sps:$4 sm:$0xff]   ;;  %v3307_v47 = vld [vmem:[%s4657_s0 + $0x78] ss:$12 sps:$4 sm:$0xff]   ;;  %v3310_v49 = vld [vmem:[%s4657_s0 + $0x94] ss:$12 sps:$4 sm:$0xff]  }
  0x11   :  { %v3308_v48 = vld [vmem:[%s4657_s0 + $0x2b8] ss:$12 sps:$4 sm:$0xff]   ;;  %v3312_v50 = vld [vmem:[%s4657_s0 + $0x2d4] ss:$12 sps:$4 sm:$0xff]   ;;  %v3314_v51 = vld [vmem:[%s4657_s0 + $0x90] ss:$12 sps:$4 sm:$0xff]  }
  0x12   :  { %988 = vmatpush1.bf16.msra.mxu0 %v3256_v5  ;;  %3239 = vmatpush1.bf16.msra.mxu1 %v3256_v5  ;;  %v3315_v52 = vld [vmem:[%s4657_s0 + $0x2d0] ss:$12 sps:$4 sm:$0xff]   ;;  %v3317_v53 = vld [vmem:[%s4657_s0 + $0xac] ss:$12 sps:$4 sm:$0xff]   ;;  %v3321_v55 = vld [vmem:[%s4657_s0 + $0xa8] ss:$12 sps:$4 sm:$0xff]  }
  0x13   :  { %989 = vmatprep.subr.bf16.mxu0 %v3661_v0  ;;  %3224 = vmatprep.subr.bf16.mxu1 %v3661_v0  ;;  %v3319_v54 = vld [vmem:[%s4657_s0 + $0x2ec] ss:$12 sps:$4 sm:$0xff]   ;;  %v3322_v56 = vld [vmem:[%s4657_s0 + $0x2e8] ss:$12 sps:$4 sm:$0xff]   ;;  %v3324_v57 = vld [vmem:[%s4657_s0 + $0xc4] ss:$12 sps:$4 sm:$0xff]  }
  0x14   :  { %v3326_v58 = vld [vmem:[%s4657_s0 + $0x8] ss:$12 sps:$4 sm:$0xff]   ;;  %v3327_v59 = vld [vmem:[%s4657_s0 + $0xc0] ss:$12 sps:$4 sm:$0xff]   ;;  %v3331_v62 = vld [vmem:[%s4657_s0 + $0x38] ss:$12 sps:$4 sm:$0xff]  }
  0x15   :  { %v3328_v60 = vld [vmem:[%s4657_s0 + $0x20] ss:$12 sps:$4 sm:$0xff]   ;;  %v3329_v61 = vld [vmem:[%s4657_s0 + $0xdc] ss:$12 sps:$4 sm:$0xff]   ;;  %v3332_v63 = vld [vmem:[%s4657_s0 + $0xd8] ss:$12 sps:$4 sm:$0xff]  }
  0x16   :  { %990 = vmatpush1.bf16.msra.mxu0 %v3257_v7  ;;  %3240 = vmatpush1.bf16.msra.mxu1 %v3257_v7  ;;  %v3334_v1 = vld [vmem:[%s4657_s0 + $0xf4] ss:$12 sps:$4 sm:$0xff]   ;;  %v3337_v3 = vld [vmem:[%s4657_s0 + $0xf0] ss:$12 sps:$4 sm:$0xff]   ;;  %v3339_v5 = vld [vmem:[%s4657_s0 + $0x10c] ss:$12 sps:$4 sm:$0xff]  }
  0x17   :  { %991 = vmatprep.subr.bf16.mxu0 %v3661_v0  ;;  %3225 = vmatprep.subr.bf16.mxu1 %v3661_v0  ;;  %v3336_v2 = vld [vmem:[%s4657_s0 + $0x68] ss:$12 sps:$4 sm:$0xff]   ;;  %v3338_v4 = vld [vmem:[%s4657_s0 + $0x80] ss:$12 sps:$4 sm:$0xff]   ;;  %v3341_v6 = vld [vmem:[%s4657_s0 + $0x98] ss:$12 sps:$4 sm:$0xff]  }
  0x18   :  { %v3342_v7 = vld [vmem:[%s4657_s0 + $0x108] ss:$12 sps:$4 sm:$0xff]   ;;  %v3343_v8 = vld [vmem:[%s4657_s0 + $0xb0] ss:$12 sps:$4 sm:$0xff]  }
  0x1a   :  { %992 = vmatpush1.bf16.msra.mxu0 %v3258_v9  ;;  %3241 = vmatpush1.bf16.msra.mxu1 %v3258_v9  ;;  %v3344_v9 = vld [vmem:[%s4657_s0 + $0x124] ss:$12 sps:$4 sm:$0xff]  }
  0x1b   :  { %993 = vmatprep.subr.bf16.mxu0 %v3661_v0  ;;  %3226 = vmatprep.subr.bf16.mxu1 %v3661_v0 }
  0x1e   :  { %994 = vmatpush1.bf16.msra.mxu0 %v3259_v10  ;;  %3242 = vmatpush1.bf16.msra.mxu1 %v3259_v10  ;;  %v3346_v10 = vld [vmem:[%s4657_s0 + $0xc8] ss:$12 sps:$4 sm:$0xff]  }
  0x1f   :  { %995 = vmatprep.subr.bf16.mxu0 %v3661_v0  ;;  %3227 = vmatprep.subr.bf16.mxu1 %v3661_v0 }
  0x22   :  { %996 = vmatpush1.bf16.msra.mxu0 %v3260_v11  ;;  %3243 = vmatpush1.bf16.msra.mxu1 %v3260_v11  ;;  %v3347_v11 = vld [vmem:[%s4657_s0 + $0x120] ss:$12 sps:$4 sm:$0xff]  }
  0x23   :  { %997 = vmatprep.subr.bf16.mxu0 %v3661_v0  ;;  %3228 = vmatprep.subr.bf16.mxu1 %v3661_v0 }
  0x26   :  { %998 = vmatpush1.bf16.msra.mxu0 %v3261_v12  ;;  %3244 = vmatpush1.bf16.msra.mxu1 %v3261_v12  ;;  %v3348_v12 = vld [vmem:[%s4657_s0 + $0xe0] ss:$12 sps:$4 sm:$0xff]  }
  0x27   :  { %999 = vmatprep.subr.bf16.mxu0 %v3661_v0  ;;  %3229 = vmatprep.subr.bf16.mxu1 %v3661_v0 }
  0x2a   :  { %1000 = vmatpush1.bf16.msra.mxu0 %v3262_v13  ;;  %3245 = vmatpush1.bf16.msra.mxu1 %v3262_v13  ;;  %v3349_v13 = vld [vmem:[%s4657_s0 + $0x13c] ss:$12 sps:$4 sm:$0xff]  }
  0x2b   :  { %1001 = vmatprep.subr.bf16.mxu0 %v3661_v0  ;;  %3230 = vmatprep.subr.bf16.mxu1 %v3661_v0 }
  0x2e   :  { %1002 = vmatpush1.bf16.msra.mxu0 %v3263_v14  ;;  %3246 = vmatpush1.bf16.msra.mxu1 %v3263_v14  ;;  %v3351_v14 = vld [vmem:[%s4657_s0 + $0xf8] ss:$12 sps:$4 sm:$0xff]  }
  0x2f   :  { %1003 = vmatprep.subr.bf16.mxu0 %v3661_v0  ;;  %3231 = vmatprep.subr.bf16.mxu1 %v3661_v0 }
  0x32   :  { %1004 = vmatpush1.bf16.msra.mxu0 %v3264_v15  ;;  %3247 = vmatpush1.bf16.msra.mxu1 %v3264_v15  ;;  %v3352_v15 = vld [vmem:[%s4657_s0 + $0x138] ss:$12 sps:$4 sm:$0xff]  }
  0x33   :  { %1005 = vmatprep.subr.bf16.mxu0 %v3661_v0  ;;  %3232 = vmatprep.subr.bf16.mxu1 %v3661_v0 }
  0x36   :  { %1006 = vmatpush1.bf16.msra.mxu0 %v3265_v16  ;;  %3248 = vmatpush1.bf16.msra.mxu1 %v3265_v16  ;;  %v3353_v16 = vld [vmem:[%s4657_s0 + $0x110] ss:$12 sps:$4 sm:$0xff]  }
  0x37   :  { %1007 = vmatprep.subr.bf16.mxu0 %v3661_v0  ;;  %3233 = vmatprep.subr.bf16.mxu1 %v3661_v0 }
  0x3a   :  { %1008 = vmatpush1.bf16.msra.mxu0 %v3266_v17  ;;  %3249 = vmatpush1.bf16.msra.mxu1 %v3266_v17  ;;  %v3354_v17 = vld [vmem:[%s4657_s0 + $0x154] ss:$12 sps:$4 sm:$0xff]  }
  0x3b   :  { %1009 = vmatprep.subr.bf16.mxu0 %v3661_v0  ;;  %3234 = vmatprep.subr.bf16.mxu1 %v3661_v0  ;;  %v3333_v0 = vld [vmem:[%s4657_s0 + $0x50] ss:$12 sps:$4 sm:$0xff]  }
  0x3e   :  { %1010 = vmatpush1.bf16.msra.mxu0 %v3267_v18  ;;  %3250 = vmatpush1.bf16.msra.mxu1 %v3267_v18  ;;  %v3356_v18 = vld [vmem:[%s4657_s0 + $0x128] ss:$12 sps:$4 sm:$0xff]  }
  0x3f   :  { %3139 = vmatprep.subr.bf16.mxu1 %v3274_v19 }
  0x41   :  { %1012 = vmatmul.mubr.bf16.vlgmr.msra.gmra.mrb[0].mxu0 %v3268_v20  ;;  %1204 = vmatmul.mubr.bf16.vlgmr.msra.gmra.mrb[0].mxu1 %v3271_v21  ;;  %v3358_v20 = vld [vmem:[%s4657_s0 + $0x140] ss:$12 sps:$4 sm:$0xff]  }
  0x42   :  { %3140 = vmatpush3.bf16.msra.mxu1 %v3274_v19  ;;  %1019 = vmatprep.mubr.bf16.mxu0 %v3275_v22  ;;  %v3357_v19 = vld [vmem:[%s4657_s0 + $0x150] ss:$12 sps:$4 sm:$0xff]   ;;  %v3359_v21 = vld [vmem:[%s4657_s0 + $0x16c] ss:$12 sps:$4 sm:$0xff]  }
  0x43   :  { %1211 = vmatprep.mubr.bf16.mxu1 %v3277_v23  ;;  %3141 = vmatprep.subr.bf16.mxu1 %v3281_v24  ;;  %v3361_v22 = vld [vmem:[%s4657_s0 + $0x158] ss:$12 sps:$4 sm:$0xff]   ;;  %v3362_v23 = vld [vmem:[%s4657_s0 + $0x168] ss:$12 sps:$4 sm:$0xff]  }
  0x46   :  { %3142 = vmatpush3.bf16.msra.mxu1 %v3281_v24  ;;  %v3363_v24 = vld [vmem:[%s4657_s0 + $0x170] ss:$12 sps:$4 sm:$0xff]  }
  0x47   :  { %3143 = vmatprep.subr.bf16.mxu1 %v3288_v25 }
  0x49   :  { %1020 = vmatmul.mubr.bf16.gmra.mrb[4].mxu0 %v3279_v26  ;;  %1212 = vmatmul.mubr.bf16.gmra.mrb[4].mxu1 %v3280_v27  ;;  %v3366_v26 = vld [vmem:[%s4657_s0 + $0x188] ss:$12 sps:$4 sm:$0xff]   ;;  %v3367_v27 = vld [vmem:[%s4657_s0 + $0x180] ss:$12 sps:$4 sm:$0xff]  }
  0x4a   :  { %1027 = vmatprep.mubr.bf16.mxu0 %v3282_v28  ;;  %1219 = vmatprep.mubr.bf16.mxu1 %v3284_v29  ;;  %v3368_v28 = vld [vmem:[%s4657_s0 + $0x1a0] ss:$12 sps:$4 sm:$0xff]   ;;  %v3369_v29 = vld [vmem:[%s4657_s0 + $0x19c] ss:$12 sps:$4 sm:$0xff]  }
  0x4b   :  { %3144 = vmatpush3.bf16.msra.mxu1 %v3288_v25  ;;  %v3364_v25 = vld [vmem:[%s4657_s0 + $0x184] ss:$12 sps:$4 sm:$0xff]  }
  0x4c   :  { %3145 = vmatprep.subr.bf16.mxu1 %v3295_v30 }
  0x4f   :  { %3146 = vmatpush3.bf16.msra.mxu1 %v3295_v30  ;;  %v3371_v30 = vld [vmem:[%s4657_s0 + $0x1b8] ss:$12 sps:$4 sm:$0xff]  }
  0x50   :  { %3147 = vmatprep.subr.bf16.mxu1 %v3302_v32 }
  0x51   :  { %1028 = vmatmul.mubr.bf16.gmra.mrb[8].mxu0 %v3286_v31  ;;  %1220 = vmatmul.mubr.bf16.gmra.mrb[8].mxu1 %v3287_v33  ;;  %v3372_v31 = vld [vmem:[%s4657_s0 + $0x198] ss:$12 sps:$4 sm:$0xff]   ;;  %v3374_v33 = vld [vmem:[%s4657_s0 + $0x1b4] ss:$12 sps:$4 sm:$0xff]  }
  0x52   :  { %1035 = vmatprep.mubr.bf16.mxu0 %v3289_v34  ;;  %1227 = vmatprep.mubr.bf16.mxu1 %v3291_v35  ;;  %v3376_v34 = vld [vmem:[%s4657_s0 + $0x1e8] ss:$12 sps:$4 sm:$0xff]   ;;  %v3377_v35 = vld [vmem:[%s4657_s0 + $0x1b0] ss:$12 sps:$4 sm:$0xff]  }
  0x53   :  { %3148 = vmatpush3.bf16.msra.mxu1 %v3302_v32  ;;  %v3373_v32 = vld [vmem:[%s4657_s0 + $0x1d0] ss:$12 sps:$4 sm:$0xff]  }
  0x54   :  { %3149 = vmatprep.subr.bf16.mxu1 %v3309_v36 }
  0x57   :  { %3150 = vmatpush3.bf16.msra.mxu1 %v3309_v36  ;;  %v3378_v36 = vld [vmem:[%s4657_s0 + $0x200] ss:$12 sps:$4 sm:$0xff]  }
  0x58   :  { %3151 = vmatprep.subr.bf16.mxu1 %v3316_v41 }
  0x59   :  { %1036 = vmatmul.mubr.bf16.gmra.mrb[12].mxu0 %v3293_v37  ;;  %1228 = vmatmul.mubr.bf16.gmra.mrb[12].mxu1 %v3294_v38  ;;  %v3379_v37 = vld [vmem:[%s4657_s0 + $0x1cc] ss:$12 sps:$4 sm:$0xff]  }
  0x5a   :  { %1043 = vmatprep.mubr.bf16.mxu0 %v3296_v39  ;;  %1235 = vmatprep.mubr.bf16.mxu1 %v3298_v40  ;;  %v3381_v38 = vld [vmem:[%s4657_s0 + $0x218] ss:$12 sps:$4 sm:$0xff]   ;;  %v3382_v39 = vld [vmem:[%s4657_s0 + $0x1c8] ss:$12 sps:$4 sm:$0xff]   ;;  %v3383_v40 = vld [vmem:[%s4657_s0 + $0x230] ss:$12 sps:$4 sm:$0xff]  }
  0x5b   :  { %3152 = vmatpush3.bf16.msra.mxu1 %v3316_v41  ;;  %v3384_v41 = vld [vmem:[%s4657_s0 + $0x1e4] ss:$12 sps:$4 sm:$0xff]  }
  0x5c   :  { %3153 = vmatprep.subr.bf16.mxu1 %v3323_v42 }
  0x5f   :  { %3154 = vmatpush3.bf16.msra.mxu1 %v3323_v42  ;;  %v3386_v42 = vld [vmem:[%s4657_s0 + $0x248] ss:$12 sps:$4 sm:$0xff]  }
  0x61   :  { %1044 = vmatmul.mubr.bf16.gmra.mrb[16].mxu0 %v3300_v43  ;;  %1236 = vmatmul.mubr.bf16.gmra.mrb[16].mxu1 %v3301_v44  ;;  %v3387_v43 = vld [vmem:[%s4657_s0 + $0x1e0] ss:$12 sps:$4 sm:$0xff]  }
  0x62   :  { %1051 = vmatprep.mubr.bf16.mxu0 %v3303_v45  ;;  %1243 = vmatprep.mubr.bf16.mxu1 %v3305_v46  ;;  %v3388_v44 = vld [vmem:[%s4657_s0 + $0x260] ss:$12 sps:$4 sm:$0xff]   ;;  %v3389_v45 = vld [vmem:[%s4657_s0 + $0x1fc] ss:$12 sps:$4 sm:$0xff]   ;;  %v3391_v46 = vld [vmem:[%s4657_s0 + $0x278] ss:$12 sps:$4 sm:$0xff]  }
  0x69   :  { %1052 = vmatmul.mubr.bf16.gmra.mrb[20].mxu0 %v3307_v47  ;;  %1244 = vmatmul.mubr.bf16.gmra.mrb[20].mxu1 %v3308_v48  ;;  %v3392_v47 = vld [vmem:[%s4657_s0 + $0x1f8] ss:$12 sps:$4 sm:$0xff]   ;;  %v3393_v48 = vld [vmem:[%s4657_s0 + $0x290] ss:$12 sps:$4 sm:$0xff]  }
  0x6a   :  { %1059 = vmatprep.mubr.bf16.mxu0 %v3310_v49  ;;  %1251 = vmatprep.mubr.bf16.mxu1 %v3312_v50  ;;  %v3394_v49 = vld [vmem:[%s4657_s0 + $0x214] ss:$12 sps:$4 sm:$0xff]  }
  0x6b   :  { %v3396_v50 = vld [vmem:[%s4657_s0 + $0x2a8] ss:$12 sps:$4 sm:$0xff]  }
  0x71   :  { %1060 = vmatmul.mubr.bf16.gmra.mrb[24].mxu0 %v3314_v51  ;;  %1252 = vmatmul.mubr.bf16.gmra.mrb[24].mxu1 %v3315_v52  ;;  %v3397_v51 = vld [vmem:[%s4657_s0 + $0x210] ss:$12 sps:$4 sm:$0xff]   ;;  %v3398_v52 = vld [vmem:[%s4657_s0 + $0x2c0] ss:$12 sps:$4 sm:$0xff]  }
  0x72   :  { %1067 = vmatprep.mubr.bf16.mxu0 %v3317_v53  ;;  %1259 = vmatprep.mubr.bf16.mxu1 %v3319_v54  ;;  %v3399_v53 = vld [vmem:[%s4657_s0 + $0x22c] ss:$12 sps:$4 sm:$0xff]  }
  0x73   :  { %v3401_v54 = vld [vmem:[%s4657_s0 + $0x2d8] ss:$12 sps:$4 sm:$0xff]  }
  0x79   :  { %1068 = vmatmul.mubr.bf16.gmra.mrb[28].mxu0 %v3321_v55  ;;  %1260 = vmatmul.mubr.bf16.gmra.mrb[28].mxu1 %v3322_v56  ;;  %v3402_v55 = vld [vmem:[%s4657_s0 + $0x228] ss:$12 sps:$4 sm:$0xff]   ;;  %v3403_v56 = vld [vmem:[%s4657_s0 + $0x2f0] ss:$12 sps:$4 sm:$0xff]  }
  0x7a   :  { %1075 = vmatprep.mubr.bf16.mxu0 %v3324_v57  ;;  %3155 = vmatprep.mubr.bf16.mxu1 %v3326_v58 }
  0x81   :  { %1076 = vmatmul.mubr.bf16.gmra.mrb[32].mxu0 %v3327_v59  ;;  %3156 = vmatmul.mubr.bf16.vlgmr.msra.gmra.mrb[32].mxu1 %v3328_v60 }
  0x82   :  { %1083 = vmatprep.mubr.bf16.mxu0 %v3329_v61  ;;  %3159 = vmatprep.mubr.bf16.mxu1 %v3331_v62 }
  0x89   :  { %1084 = vmatmul.mubr.bf16.gmra.mrb[36].mxu0 %v3332_v63  ;;  %3160 = vmatmul.mubr.bf16.gmra.mrb[36].mxu1 %v3333_v0 }
  0x8a   :  { %1091 = vmatprep.mubr.bf16.mxu0 %v3334_v1  ;;  %3163 = vmatprep.mubr.bf16.mxu1 %v3336_v2 }
  0x91   :  { %1092 = vmatmul.mubr.bf16.gmra.mrb[40].mxu0 %v3337_v3  ;;  %3164 = vmatmul.mubr.bf16.gmra.mrb[40].mxu1 %v3338_v4 }
  0x92   :  { %1099 = vmatprep.mubr.bf16.mxu0 %v3339_v5  ;;  %3167 = vmatprep.mubr.bf16.mxu1 %v3341_v6 }
  0x99   :  { %1100 = vmatmul.mubr.bf16.gmra.mrb[44].mxu0 %v3342_v7  ;;  %3168 = vmatmul.mubr.bf16.gmra.mrb[44].mxu1 %v3343_v8 }
  0x9a   :  { %1107 = vmatprep.mubr.bf16.mxu0 %v3344_v9  ;;  %3171 = vmatprep.mubr.bf16.mxu1 %v3346_v10 }
  0xa1   :  { %1108 = vmatmul.mubr.bf16.gmra.mrb[48].mxu0 %v3347_v11  ;;  %3172 = vmatmul.mubr.bf16.gmra.mrb[48].mxu1 %v3348_v12 }
  0xa2   :  { %1115 = vmatprep.mubr.bf16.mxu0 %v3349_v13  ;;  %3175 = vmatprep.mubr.bf16.mxu1 %v3351_v14 }
  0xa9   :  { %1116 = vmatmul.mubr.bf16.gmra.mrb[52].mxu0 %v3352_v15  ;;  %3176 = vmatmul.mubr.bf16.gmra.mrb[52].mxu1 %v3353_v16 }
  0xaa   :  { %1123 = vmatprep.mubr.bf16.mxu0 %v3354_v17  ;;  %3179 = vmatprep.mubr.bf16.mxu1 %v3356_v18 }
  0xb1   :  { %1124 = vmatmul.mubr.bf16.gmra.mrb[56].mxu0 %v3357_v19  ;;  %3180 = vmatmul.mubr.bf16.gmra.mrb[56].mxu1 %v3358_v20 }
  0xb2   :  { %1131 = vmatprep.mubr.bf16.mxu0 %v3359_v21  ;;  %3183 = vmatprep.mubr.bf16.mxu1 %v3361_v22 }
  0xb9   :  { %1132 = vmatmul.mubr.bf16.gmra.mrb[60].mxu0 %v3362_v23  ;;  %3184 = vmatmul.mubr.bf16.gmra.mrb[60].mxu1 %v3363_v24 }
  0xba   :  { %1139 = vmatprep.mubr.bf16.mxu0 %v3364_v25  ;;  %3187 = vmatprep.mubr.bf16.mxu1 %v3366_v26 }
  0xc1   :  { %1140 = vmatmul.mubr.bf16.gmra.mrb[64].mxu0 %v3367_v27  ;;  %3188 = vmatmul.mubr.bf16.gmra.mrb[64].mxu1 %v3368_v28 }
  0xc2   :  { %1147 = vmatprep.mubr.bf16.mxu0 %v3369_v29  ;;  %3191 = vmatprep.mubr.bf16.mxu1 %v3371_v30 }
  0xc9   :  { %1148 = vmatmul.mubr.bf16.gmra.mrb[68].mxu0 %v3372_v31  ;;  %3192 = vmatmul.mubr.bf16.gmra.mrb[68].mxu1 %v3373_v32 }
  0xca   :  { %1155 = vmatprep.mubr.bf16.mxu0 %v3374_v33  ;;  %3195 = vmatprep.mubr.bf16.mxu1 %v3376_v34 }
  0xd1   :  { %1156 = vmatmul.mubr.bf16.gmra.mrb[72].mxu0 %v3377_v35  ;;  %3196 = vmatmul.mubr.bf16.gmra.mrb[72].mxu1 %v3378_v36 }
  0xd2   :  { %1163 = vmatprep.mubr.bf16.mxu0 %v3379_v37  ;;  %3199 = vmatprep.mubr.bf16.mxu1 %v3381_v38 }
  0xd9   :  { %1164 = vmatmul.mubr.bf16.gmra.mrb[76].mxu0 %v3382_v39  ;;  %3200 = vmatmul.mubr.bf16.gmra.mrb[76].mxu1 %v3383_v40 }
  0xda   :  { %1171 = vmatprep.mubr.bf16.mxu0 %v3384_v41  ;;  %3203 = vmatprep.mubr.bf16.mxu1 %v3386_v42 }
  0xe1   :  { %1172 = vmatmul.mubr.bf16.gmra.mrb[80].mxu0 %v3387_v43  ;;  %3204 = vmatmul.mubr.bf16.gmra.mrb[80].mxu1 %v3388_v44 }
  0xe2   :  { %1179 = vmatprep.mubr.bf16.mxu0 %v3389_v45  ;;  %3207 = vmatprep.mubr.bf16.mxu1 %v3391_v46 }
  0xe9   :  { %1180 = vmatmul.mubr.bf16.gmra.mrb[84].mxu0 %v3392_v47  ;;  %3208 = vmatmul.mubr.bf16.gmra.mrb[84].mxu1 %v3393_v48 }
  0xea   :  { %1187 = vmatprep.mubr.bf16.mxu0 %v3394_v49  ;;  %3211 = vmatprep.mubr.bf16.mxu1 %v3396_v50 }
  0xf1   :  { %1188 = vmatmul.mubr.bf16.gmra.mrb[88].mxu0 %v3397_v51  ;;  %3212 = vmatmul.mubr.bf16.gmra.mrb[88].mxu1 %v3398_v52 }
  0xf2   :  { %1195 = vmatprep.mubr.bf16.mxu0 %v3399_v53  ;;  %3215 = vmatprep.mubr.bf16.mxu1 %v3401_v54 }
  0xf9   :  { %1196 = vmatmul.mubr.bf16.gmra.mrb[92].mxu0 %v3402_v55  ;;  %3216 = vmatmul.mubr.bf16.gmra.mrb[92].mxu1 %v3403_v56 }
 0x114   :  { %v4074_v57 = vpop.f32.mrb[0].mxu0  ;;  %v4076_v58 = vpop.f32.mrb[0].mxu1 }
 0x115   :  { %v1015_v59 = vpop.f32.mrb[1].mxu0  ;;  %v1207_v60 = vpop.f32.mrb[1].mxu1 }
 0x116   :  { %v4078_v61 = vpop.f32.mrb[2].mxu0  ;;  %v4080_v62 = vpop.f32.mrb[2].mxu1 }
 0x117   :  { %v1018_v63 = vpop.f32.mrb[3].mxu0  ;;  %v1210_v0 = vpop.f32.mrb[3].mxu1 }
 0x118   :  { %v4141_v63 = vld [vmem:[%s4658_s2] ss:$0 sm:$0xff] }
 0x11c   :  { %v1021_v1 = vpop.f32.mrb[4].mxu0  ;;  %v4082_v2 = vpop.f32.mrb[4].mxu1 }
 0x11d   :  { %v1023_v3 = vpop.f32.mrb[5].mxu0  ;;  %v1215_v4 = vpop.f32.mrb[5].mxu1 }
 0x11e   :  { %v4084_v5 = vpop.f32.mrb[6].mxu0  ;;  %v4086_v6 = vpop.f32.mrb[6].mxu1 }
 0x11f   :  { %v1026_v7 = vpop.f32.mrb[7].mxu0  ;;  %v1218_v8 = vpop.f32.mrb[7].mxu1 }
 0x124   :  { %v4088_v9 = vpop.f32.mrb[8].mxu0  ;;  %v4090_v10 = vpop.f32.mrb[8].mxu1 }
 0x125   :  { %v1031_v11 = vpop.f32.mrb[9].mxu0  ;;  %v1223_v12 = vpop.f32.mrb[9].mxu1 }
 0x126   :  { %v4092_v13 = vpop.f32.mrb[10].mxu0  ;;  %v4094_v14 = vpop.f32.mrb[10].mxu1 }
 0x127   :  { %v1034_v15 = vpop.f32.mrb[11].mxu0  ;;  %v1226_v16 = vpop.f32.mrb[11].mxu1 }
 0x12c   :  { %v4096_v17 = vpop.f32.mrb[12].mxu0  ;;  %v4098_v18 = vpop.f32.mrb[12].mxu1 }
 0x12d   :  { %v1039_v19 = vpop.f32.mrb[13].mxu0  ;;  %v1231_v20 = vpop.f32.mrb[13].mxu1 }
 0x12e   :  { %v4100_v21 = vpop.f32.mrb[14].mxu0  ;;  %v4102_v22 = vpop.f32.mrb[14].mxu1 }
 0x12f   :  { %v1042_v23 = vpop.f32.mrb[15].mxu0  ;;  %v1234_v24 = vpop.f32.mrb[15].mxu1 }
 0x134   :  { %v4104_v25 = vpop.f32.mrb[16].mxu0  ;;  %v4106_v26 = vpop.f32.mrb[16].mxu1 }
 0x135   :  { %v1047_v27 = vpop.f32.mrb[17].mxu0  ;;  %v1239_v28 = vpop.f32.mrb[17].mxu1 }
 0x136   :  { %v4108_v29 = vpop.f32.mrb[18].mxu0  ;;  %v4110_v30 = vpop.f32.mrb[18].mxu1 }
 0x137   :  { %v1050_v31 = vpop.f32.mrb[19].mxu0  ;;  %v1242_v32 = vpop.f32.mrb[19].mxu1 }
 0x13c   :  { %v4112_v33 = vpop.f32.mrb[20].mxu0  ;;  %v4114_v34 = vpop.f32.mrb[20].mxu1 }
 0x13d   :  { %v1055_v35 = vpop.f32.mrb[21].mxu0  ;;  %v1247_v36 = vpop.f32.mrb[21].mxu1 }
 0x13e   :  { %v4116_v37 = vpop.f32.mrb[22].mxu0  ;;  %v4118_v38 = vpop.f32.mrb[22].mxu1 }
 0x13f   :  { %v1058_v39 = vpop.f32.mrb[23].mxu0  ;;  %v1250_v40 = vpop.f32.mrb[23].mxu1 }
 0x144   :  { %v4120_v41 = vpop.f32.mrb[24].mxu0  ;;  %v4122_v42 = vpop.f32.mrb[24].mxu1 }
 0x145   :  { %v1063_v43 = vpop.f32.mrb[25].mxu0  ;;  %v1255_v44 = vpop.f32.mrb[25].mxu1 }
 0x146   :  { %v4124_v45 = vpop.f32.mrb[26].mxu0  ;;  %v4126_v46 = vpop.f32.mrb[26].mxu1 }
 0x147   :  { %v1066_v47 = vpop.f32.mrb[27].mxu0  ;;  %v1258_v48 = vpop.f32.mrb[27].mxu1 }
 0x14c   :  { %v4128_v49 = vpop.f32.mrb[28].mxu0  ;;  %v4130_v50 = vpop.f32.mrb[28].mxu1 }
 0x14d   :  { %v1071_v51 = vpop.f32.mrb[29].mxu0  ;;  %v1263_v52 = vpop.f32.mrb[29].mxu1 }
 0x14e   :  { %v4132_v53 = vpop.f32.mrb[30].mxu0  ;;  %v4134_v54 = vpop.f32.mrb[30].mxu1 }
 0x14f   :  { %v1074_v55 = vpop.f32.mrb[31].mxu0  ;;  %v1266_v56 = vpop.f32.mrb[31].mxu1 }
 0x154   :  { %v4136_v59 = vpop.f32.mrb[32].mxu0  ;;  %v3157_v60 = vpop.f32.mrb[32].mxu1 }
 0x155   :  { %v1311_v0 = vadd.f32 %v3157_v60, %v1021_v1  ;;  %v1079_v3 = vpop.f32.mrb[33].mxu0  ;;  %v1302_v4 = vpop.f32.mrb[33].mxu1 }
 0x156   :  { %v1303_v7 = vadd.f32 %v1302_v4, %v4074_v57  ;;  %v4144_v8 = vpop.f32.mrb[34].mxu0  ;;  %v3158_v11 = vpop.f32.mrb[34].mxu1 }
 0x157   :  { %v4147_v12 = vadd.f32 %v4141_v63, %v1311_v0  ;;  %v1314_v15 = vadd.f32 %v3158_v11, %v4084_v5  ;;  %v1082_v16 = vpop.f32.mrb[35].mxu0  ;;  %v1305_v19 = vpop.f32.mrb[35].mxu1 }
 0x158   :  { %v4151_v20 = vadd.f32 %v4141_v63, %v1303_v7  ;;  %v1306_v23 = vadd.f32 %v1305_v19, %v4078_v61 }
 0x159   :  { %v2718_v1 = vmul.f32 -1.442695, %v4147_v12  ;;  %v4156_v24 = vadd.f32 %v4141_v63, %v1314_v15 }
 0x15a   :  { %v2716_v57 = vmul.f32 -1.442695, %v4151_v20  ;;  %v4160_v27 = vadd.f32 %v4141_v63, %v1306_v23 }
 0x15b   :  { %3404 = vpow2.f32 %v2718_v1  ;;  %v2719_v5 = vmul.f32 -1.442695, %v4156_v24 }
 0x15c   :  { %3406 = vpow2.f32 %v2716_v57  ;;  %v2717_v28 = vmul.f32 -1.442695, %v4160_v27  ;;  %v4164_v31 = vpop.f32.mrb[36].mxu0  ;;  %v3161_v32 = vpop.f32.mrb[36].mxu1 }
 0x15d   :  { %3408 = vpow2.f32 %v2719_v5  ;;  %v1327_v61 = vadd.f32 %v3161_v32, %v4096_v17  ;;  %v1087_v35 = vpop.f32.mrb[37].mxu0  ;;  %v1318_v36 = vpop.f32.mrb[37].mxu1 }
 0x15e   :  { %3410 = vpow2.f32 %v2717_v28  ;;  %v1319_v39 = vadd.f32 %v1318_v36, %v4088_v9  ;;  %v4168_v40 = vpop.f32.mrb[38].mxu0  ;;  %v3162_v43 = vpop.f32.mrb[38].mxu1 }
 0x15f   :  { %v4171_v44 = vadd.f32 %v4141_v63, %v1327_v61  ;;  %v1330_v47 = vadd.f32 %v3162_v43, %v4100_v21  ;;  %v1090_v48 = vpop.f32.mrb[39].mxu0  ;;  %v1321_v51 = vpop.f32.mrb[39].mxu1 }
 0x160   :  { %v4175_v52 = vadd.f32 %v4141_v63, %v1319_v39  ;;  %v1322_v17 = vadd.f32 %v1321_v51, %v4092_v13 }
 0x161   :  { %v2722_v55 = vmul.f32 -1.442695, %v4171_v44  ;;  %v4180_v56 = vadd.f32 %v4141_v63, %v1330_v47 }
 0x162   :  { %v2720_v9 = vmul.f32 -1.442695, %v4175_v52  ;;  %v4184_v60 = vadd.f32 %v4141_v63, %v1322_v17 }
 0x163   :  { %3412 = vpow2.f32 %v2722_v55  ;;  %v2723_v21 = vmul.f32 -1.442695, %v4180_v56 }
 0x164   :  { %3414 = vpow2.f32 %v2720_v9  ;;  %v2721_v0 = vmul.f32 -1.442695, %v4184_v60  ;;  %v4188_v3 = vpop.f32.mrb[40].mxu0  ;;  %v3165_v4 = vpop.f32.mrb[40].mxu1 }
 0x165   :  { %v3405_v13 = vpop.eup %3404  ;;  %3416 = vpow2.f32 %v2723_v21  ;;  %v1343_v7 = vadd.f32 %v3165_v4, %v4112_v33  ;;  %v1095_v11 = vpop.f32.mrb[41].mxu0 }
 0x166   :  { %v1334_v15 = vpop.f32.mrb[41].mxu1  ;;  %v3407_v16 = vpop.eup %3406  ;;  %v2017_v19 = vadd.f32 1.0, %v3405_v13  ;;  %3418 = vpow2.f32 %v2721_v0 }
 0x167   :  { %v1335_v23 = vadd.f32 %v1334_v15, %v4104_v25  ;;  %v4192_v1 = vpop.f32.mrb[42].mxu0  ;;  %v3166_v57 = vpop.f32.mrb[42].mxu1  ;;  %v2015_v28 = vadd.f32 1.0, %v3407_v16  ;;  %v4195_v32 = vadd.f32 %v4141_v63, %v1343_v7 }
 0x168   :  { %v3409_v5 = vpop.eup %3408  ;;  %v1346_v61 = vadd.f32 %v3166_v57, %v4116_v37  ;;  %v1098_v35 = vpop.f32.mrb[43].mxu0  ;;  %3420 = vrcp.f32 %v2017_v19 }
 0x169   :  { %v1337_v36 = vpop.f32.mrb[43].mxu1  ;;  %v3411_v33 = vpop.eup %3410  ;;  %v2018_v39 = vadd.f32 1.0, %v3409_v5  ;;  %v4199_v43 = vadd.f32 %v4141_v63, %v1335_v23  ;;  %3422 = vrcp.f32 %v2015_v28  ;;  %v2726_v48 = vmul.f32 -1.442695, %v4195_v32 }
 0x16a   :  { %v1338_v25 = vadd.f32 %v1337_v36, %v4108_v29  ;;  %v2016_v47 = vadd.f32 1.0, %v3411_v33  ;;  %v4204_v51 = vadd.f32 %v4141_v63, %v1346_v61 }
 0x16b   :  { %3424 = vrcp.f32 %v2018_v39  ;;  %v2724_v37 = vmul.f32 -1.442695, %v4199_v43 }
 0x16c   :  { %v4208_v17 = vadd.f32 %v4141_v63, %v1338_v25  ;;  %3426 = vrcp.f32 %v2016_v47  ;;  %v2727_v55 = vmul.f32 -1.442695, %v4204_v51  ;;  %v4212_v29 = vpop.f32.mrb[44].mxu0  ;;  %v3169_v21 = vpop.f32.mrb[44].mxu1 }
 0x16d   :  { %3428 = vpow2.f32 %v2726_v48  ;;  %v3413_v0 = vpop.eup %3412  ;;  %v1359_v4 = vadd.f32 %v3169_v21, %v4128_v49  ;;  %v1103_v13 = vpop.f32.mrb[45].mxu0 }
 0x16e   :  { %v2725_v9 = vmul.f32 -1.442695, %v4208_v17  ;;  %3430 = vpow2.f32 %v2724_v37  ;;  %v1350_v7 = vpop.f32.mrb[45].mxu1  ;;  %v3415_v11 = vpop.eup %3414  ;;  %v2021_v15 = vadd.f32 1.0, %v3413_v0 }
 0x16f   :  { %3432 = vpow2.f32 %v2727_v55  ;;  %v1351_v16 = vadd.f32 %v1350_v7, %v4120_v41  ;;  %v4216_v19 = vpop.f32.mrb[46].mxu0  ;;  %v3170_v23 = vpop.f32.mrb[46].mxu1  ;;  %v2019_v5 = vadd.f32 1.0, %v3415_v11  ;;  %v4219_v28 = vadd.f32 %v4141_v63, %v1359_v4 }
 0x170   :  { %v3417_v57 = vpop.eup %3416  ;;  %3434 = vpow2.f32 %v2725_v9  ;;  %v1362_v61 = vadd.f32 %v3170_v23, %v4132_v53  ;;  %v1106_v35 = vpop.f32.mrb[47].mxu0 }
 0x171   :  { %v1353_v49 = vpop.f32.mrb[47].mxu1  ;;  %v3419_v36 = vpop.eup %3418  ;;  %3436 = vrcp.f32 %v2021_v15  ;;  %v2022_v33 = vadd.f32 1.0, %v3417_v57  ;;  %v4223_v39 = vadd.f32 %v4141_v63, %v1351_v16  ;;  %v2730_v47 = vmul.f32 -1.442695, %v4219_v28 }
 0x172   :  { %v1354_v41 = vadd.f32 %v1353_v49, %v4124_v45  ;;  %3438 = vrcp.f32 %v2019_v5  ;;  %v2020_v25 = vadd.f32 1.0, %v3419_v36  ;;  %v4228_v48 = vadd.f32 %v4141_v63, %v1362_v61  ;;  %v3421_v37 = vpop.eup %3420 }
 0x173   :  { %3440 = vrcp.f32 %v2022_v33  ;;  %v2728_v53 = vmul.f32 -1.442695, %v4223_v39  ;;  %v3423_v9 = vpop.eup %3422  ;;  %v2209_v11 = vmul.f32 %v3421_v37, %v4147_v12 }
 0x174   :  { %v4232_v55 = vadd.f32 %v4141_v63, %v1354_v41  ;;  %3442 = vrcp.f32 %v2020_v25  ;;  %v2731_v21 = vmul.f32 -1.442695, %v4228_v48  ;;  %v4236_v4 = vpop.f32.mrb[48].mxu0  ;;  %v3173_v13 = vpop.f32.mrb[48].mxu1  ;;  %v2207_v61 = vmul.f32 %v3423_v9, %v4151_v20 }
 0x175   :  { %v3425_v0 = vpop.eup %3424  ;;  %3444 = vpow2.f32 %v2730_v47  ;;  %v1375_v16 = vadd.f32 %v3173_v13, %v4164_v31  ;;  %v1111_v23 = vpop.f32.mrb[49].mxu0 }
 0x176   :  { %v2729_v45 = vmul.f32 -1.442695, %v4232_v55  ;;  %v3427_v7 = vpop.eup %3426  ;;  %v2210_v15 = vmul.f32 %v3425_v0, %v4156_v24  ;;  %3446 = vpow2.f32 %v2728_v53  ;;  %v1366_v57 = vpop.f32.mrb[49].mxu1 }
 0x177   :  { %v3429_v5 = vpop.eup %3428  ;;  %v2208_v35 = vmul.f32 %v3427_v7, %v4160_v27  ;;  %3448 = vpow2.f32 %v2731_v21  ;;  %v1367_v49 = vadd.f32 %v1366_v57, %v4136_v59  ;;  %v4244_v36 = vpop.f32.mrb[50].mxu0  ;;  %v4247_v24 = vadd.f32 %v4141_v63, %v1375_v16 }
 0x178   :  { %v3174_v33 = vpop.f32.mrb[50].mxu1  ;;  %v3431_v41 = vpop.eup %3430  ;;  %v2916_v12 = vpack.c.bf16 %v2210_v15, %v2209_v11  ;;  %v2025_v25 = vadd.f32 1.0, %v3429_v5  ;;  %3450 = vpow2.f32 %v2729_v45 }
 0x179   :  { %v1114_v31 = vpop.f32.mrb[51].mxu0  ;;  %v1369_v47 = vpop.f32.mrb[51].mxu1  ;;  %v2911_v53 = vpack.c.bf16 %v2208_v35, %v2207_v61  ;;  %v2023_v20 = vadd.f32 1.0, %v3431_v41  ;;  %v4250_v27 = vadd.f32 %v4141_v63, %v1367_v49  ;;  %v1378_v59 = vadd.f32 %v3174_v33, %v4168_v40 }
 0x17a   :  { %v3433_v37 = vpop.eup %3432  ;;  %3068 = vst [vmem:[%s4659_s3 + $0x8] sm:$0xff] %v2916_v12   ;;  %3452 = vrcp.f32 %v2025_v25  ;;  %v2734_v0 = vmul.f32 -1.442695, %v4247_v24  ;;  %v1370_v45 = vadd.f32 %v1369_v47, %v4144_v8 }
 0x17b   :  { %v3435_v9 = vpop.eup %3434  ;;  %v2026_v21 = vadd.f32 1.0, %v3433_v37  ;;  %2912 = vst [vmem:[%s4659_s3] sm:$0xff] %v2911_v53   ;;  %3454 = vrcp.f32 %v2023_v20  ;;  %v2732_v40 = vmul.f32 -1.442695, %v4250_v27  ;;  %v4263_v11 = vadd.f32 %v4141_v63, %v1378_v59 }
 0x17c   :  { %v3437_v13 = vpop.eup %3436  ;;  %v2024_v7 = vadd.f32 1.0, %v3435_v9  ;;  %v4266_v16 = vadd.f32 %v4141_v63, %v1370_v45  ;;  %v1117_v5 = vpop.f32.mrb[52].mxu0 }
 0x17d   :  { %v3439_v15 = vpop.eup %3438  ;;  %3456 = vrcp.f32 %v2026_v21  ;;  %v2213_v8 = vmul.f32 %v3437_v13, %v4171_v44  ;;  %v2735_v57 = vmul.f32 -1.442695, %v4263_v11  ;;  %v3177_v61 = vpop.f32.mrb[52].mxu1 }
 0x17e   :  { %v3441_v23 = vpop.eup %3440  ;;  %3458 = vrcp.f32 %v2024_v7  ;;  %v2733_v33 = vmul.f32 -1.442695, %v4266_v16  ;;  %v1391_v41 = vadd.f32 %v3177_v61, %v4212_v29  ;;  %v1119_v12 = vpop.f32.mrb[53].mxu0  ;;  %v2211_v47 = vmul.f32 %v3439_v15, %v4175_v52 }
 0x17f   :  { %v3443_v35 = vpop.eup %3442  ;;  %v2214_v49 = vmul.f32 %v3441_v23, %v4180_v56  ;;  %3460 = vpow2.f32 %v2734_v0  ;;  %v1382_v25 = vpop.f32.mrb[53].mxu1 }
 0x180   :  { %v3445_v31 = vpop.eup %3444  ;;  %v2212_v44 = vmul.f32 %v3443_v35, %v4184_v60  ;;  %3462 = vpow2.f32 %v2732_v40  ;;  %v1383_v37 = vadd.f32 %v1382_v25, %v4188_v3  ;;  %v1120_v53 = vpop.f32.mrb[54].mxu0  ;;  %v4277_v21 = vadd.f32 %v4141_v63, %v1391_v41 }
 0x181   :  { %v3178_v20 = vpop.f32.mrb[54].mxu1  ;;  %v3447_v59 = vpop.eup %3446  ;;  %v2926_v9 = vpack.c.bf16 %v2214_v49, %v2213_v8  ;;  %v2029_v56 = vadd.f32 1.0, %v3445_v31  ;;  %3464 = vpow2.f32 %v2735_v57 }
 0x182   :  { %v1122_v29 = vpop.f32.mrb[55].mxu0  ;;  %v1385_v0 = vpop.f32.mrb[55].mxu1  ;;  %v2921_v13 = vpack.c.bf16 %v2212_v44, %v2211_v47  ;;  %v2027_v7 = vadd.f32 1.0, %v3447_v59  ;;  %3466 = vpow2.f32 %v2733_v33  ;;  %v4280_v52 = vadd.f32 %v4141_v63, %v1383_v37 }
 0x183   :  { %v3449_v45 = vpop.eup %3448  ;;  %3070 = vst [vmem:[%s4659_s3 + $0x18] sm:$0xff] %v2926_v9   ;;  %3468 = vrcp.f32 %v2029_v56  ;;  %v2738_v40 = vmul.f32 -1.442695, %v4277_v21  ;;  %v1394_v15 = vadd.f32 %v3178_v20, %v4216_v19  ;;  %v1386_v57 = vadd.f32 %v1385_v0, %v4192_v1 }
 0x184   :  { %v3451_v60 = vpop.eup %3450  ;;  %v2030_v3 = vadd.f32 1.0, %v3449_v45  ;;  %3069 = vst [vmem:[%s4659_s3 + $0x10] sm:$0xff] %v2921_v13   ;;  %3470 = vrcp.f32 %v2027_v7  ;;  %v2736_v8 = vmul.f32 -1.442695, %v4280_v52  ;;  %v1125_v41 = vpop.f32.mrb[56].mxu0 }
 0x185   :  { %v2028_v23 = vadd.f32 1.0, %v3451_v60  ;;  %v3453_v61 = vpop.eup %3452  ;;  %v4293_v35 = vadd.f32 %v4141_v63, %v1394_v15  ;;  %v4297_v19 = vadd.f32 %v4141_v63, %v1386_v57  ;;  %v3181_v12 = vpop.f32.mrb[56].mxu1 }
 0x186   :  { %3472 = vrcp.f32 %v2030_v3  ;;  %v3455_v49 = vpop.eup %3454  ;;  %v2217_v33 = vmul.f32 %v3453_v61, %v4195_v32  ;;  %v1407_v47 = vadd.f32 %v3181_v12, %v1117_v5  ;;  %v1127_v44 = vpop.f32.mrb[57].mxu0 }
 0x187   :  { %3474 = vrcp.f32 %v2028_v23  ;;  %v3457_v25 = vpop.eup %3456  ;;  %v2215_v31 = vmul.f32 %v3455_v49, %v4199_v43  ;;  %v2739_v1 = vmul.f32 -1.442695, %v4293_v35  ;;  %v1398_v37 = vpop.f32.mrb[57].mxu1  ;;  %v2737_v32 = vmul.f32 -1.442695, %v4297_v19 }
 0x188   :  { %3476 = vpow2.f32 %v2738_v40  ;;  %v3459_v20 = vpop.eup %3458  ;;  %v2218_v59 = vmul.f32 %v3457_v25, %v4204_v51  ;;  %v1399_v9 = vadd.f32 %v1398_v37, %v4236_v4  ;;  %v4304_v56 = vpop.f32.mrb[58].mxu0  ;;  %v4308_v45 = vadd.f32 %v4141_v63, %v1407_v47 }
 0x189   :  { %3478 = vpow2.f32 %v2736_v8  ;;  %v3182_v29 = vpop.f32.mrb[58].mxu1  ;;  %v3461_v0 = vpop.eup %3460  ;;  %v2216_v43 = vmul.f32 %v3459_v20, %v4208_v17 }
 0x18a   :  { %3480 = vpow2.f32 %v2739_v1  ;;  %v1410_v5 = vadd.f32 %v3182_v29, %v1120_v53  ;;  %v1130_v13 = vpop.f32.mrb[59].mxu0  ;;  %v1401_v7 = vpop.f32.mrb[59].mxu1  ;;  %v2936_v51 = vpack.c.bf16 %v2218_v59, %v2217_v33  ;;  %v2033_v3 = vadd.f32 1.0, %v3461_v0 }
 0x18b   :  { %v3463_v60 = vpop.eup %3462  ;;  %3482 = vpow2.f32 %v2737_v32  ;;  %v4311_v40 = vadd.f32 %v4141_v63, %v1399_v9  ;;  %v2931_v15 = vpack.c.bf16 %v2216_v43, %v2215_v31  ;;  %v2742_v57 = vmul.f32 -1.442695, %v4308_v45 }
 0x18c   :  { %v3465_v4 = vpop.eup %3464  ;;  %v2031_v23 = vadd.f32 1.0, %v3463_v60  ;;  %v4314_v8 = vadd.f32 %v4141_v63, %v1410_v5  ;;  %3072 = vst [vmem:[%s4659_s3 + $0x28] sm:$0xff] %v2936_v51   ;;  %3484 = vrcp.f32 %v2033_v3  ;;  %v1402_v61 = vadd.f32 %v1401_v7, %v4244_v36  ;;  %v1133_v47 = vpop.f32.mrb[60].mxu0 }
 0x18d   :  { %v3467_v17 = vpop.eup %3466  ;;  %v2034_v53 = vadd.f32 1.0, %v3465_v4  ;;  %3071 = vst [vmem:[%s4659_s3 + $0x20] sm:$0xff] %v2931_v15   ;;  %v2740_v12 = vmul.f32 -1.442695, %v4311_v40  ;;  %v3185_v44 = vpop.f32.mrb[60].mxu1 }
 0x18e   :  { %v3469_v49 = vpop.eup %3468  ;;  %3486 = vrcp.f32 %v2031_v23  ;;  %v2032_v33 = vadd.f32 1.0, %v3467_v17  ;;  %v2743_v31 = vmul.f32 -1.442695, %v4314_v8  ;;  %v4327_v1 = vadd.f32 %v4141_v63, %v1402_v61  ;;  %v1135_v32 = vpop.f32.mrb[61].mxu0 }
 0x18f   :  { %v3471_v25 = vpop.eup %3470  ;;  %3488 = vrcp.f32 %v2034_v53  ;;  %v2221_v36 = vmul.f32 %v3469_v49, %v4219_v28  ;;  %v1423_v59 = vadd.f32 %v3185_v44, %v1133_v47  ;;  %v1414_v9 = vpop.f32.mrb[61].mxu1 }
 0x190   :  { %v3473_v37 = vpop.eup %3472  ;;  %v2219_v20 = vmul.f32 %v3471_v25, %v4223_v39  ;;  %3490 = vrcp.f32 %v2032_v33  ;;  %v2741_v43 = vmul.f32 -1.442695, %v4327_v1  ;;  %v1415_v5 = vadd.f32 %v1414_v9, %v1125_v41  ;;  %v1136_v13 = vpop.f32.mrb[62].mxu0 }
 0x191   :  { %v3475_v29 = vpop.eup %3474  ;;  %v2222_v0 = vmul.f32 %v3473_v37, %v4228_v48  ;;  %3492 = vpow2.f32 %v2742_v57  ;;  %v3186_v7 = vpop.f32.mrb[62].mxu1  ;;  %v4335_v28 = vadd.f32 %v4141_v63, %v1423_v59 }
 0x192   :  { %v3477_v60 = vpop.eup %3476  ;;  %v2220_v51 = vmul.f32 %v3475_v29, %v4232_v55  ;;  %3494 = vpow2.f32 %v2740_v12  ;;  %v1426_v39 = vadd.f32 %v3186_v7, %v1136_v13  ;;  %v1138_v3 = vpop.f32.mrb[63].mxu0  ;;  %v4338_v48 = vadd.f32 %v4141_v63, %v1415_v5 }
 0x193   :  { %v1417_v4 = vpop.f32.mrb[63].mxu1  ;;  %v3479_v15 = vpop.eup %3478  ;;  %v2946_v23 = vpack.c.bf16 %v2222_v0, %v2221_v36  ;;  %v2037_v17 = vadd.f32 1.0, %v3477_v60  ;;  %3496 = vpow2.f32 %v2743_v31  ;;  %v2746_v49 = vmul.f32 -1.442695, %v4335_v28 }
 0x194   :  { %v3481_v41 = vpop.eup %3480  ;;  %v2941_v53 = vpack.c.bf16 %v2220_v51, %v2219_v20  ;;  %v2035_v57 = vadd.f32 1.0, %v3479_v15  ;;  %3498 = vpow2.f32 %v2741_v43  ;;  %v4345_v33 = vadd.f32 %v4141_v63, %v1426_v39  ;;  %v1141_v37 = vpop.f32.mrb[64].mxu0 }
 0x195   :  { %v3483_v61 = vpop.eup %3482  ;;  %3074 = vst [vmem:[%s4659_s3 + $0x38] sm:$0xff] %v2946_v23   ;;  %3500 = vrcp.f32 %v2037_v17  ;;  %v2038_v55 = vadd.f32 1.0, %v3481_v41  ;;  %v2744_v25 = vmul.f32 -1.442695, %v4338_v48  ;;  %v1418_v31 = vadd.f32 %v1417_v4, %v4304_v56  ;;  %v3189_v36 = vpop.f32.mrb[64].mxu1 }
 0x196   :  { %3073 = vst [vmem:[%s4659_s3 + $0x30] sm:$0xff] %v2941_v53   ;;  %3502 = vrcp.f32 %v2035_v57  ;;  %v2036_v12 = vadd.f32 1.0, %v3483_v61  ;;  %v3485_v47 = vpop.eup %3484  ;;  %v2747_v44 = vmul.f32 -1.442695, %v4345_v33  ;;  %v1143_v32 = vpop.f32.mrb[65].mxu0 }
 0x197   :  { %3504 = vrcp.f32 %v2038_v55  ;;  %v4354_v59 = vadd.f32 %v4141_v63, %v1418_v31  ;;  %v1430_v9 = vpop.f32.mrb[65].mxu1  ;;  %v2225_v0 = vmul.f32 %v3485_v47, %v4247_v24  ;;  %v1144_v5 = vpop.f32.mrb[66].mxu0 }
 0x198   :  { %v3487_v20 = vpop.eup %3486  ;;  %3506 = vrcp.f32 %v2036_v12  ;;  %v1431_v43 = vadd.f32 %v1430_v9, %v1141_v37  ;;  %v3190_v56 = vpop.f32.mrb[66].mxu1 }
 0x199   :  { %v3489_v29 = vpop.eup %3488  ;;  %3508 = vpow2.f32 %v2746_v49  ;;  %v2223_v7 = vmul.f32 %v3487_v20, %v4250_v27  ;;  %v2745_v51 = vmul.f32 -1.442695, %v4354_v59  ;;  %v1146_v39 = vpop.f32.mrb[67].mxu0 }
 0x19a   :  { %v3491_v13 = vpop.eup %3490  ;;  %v2226_v60 = vmul.f32 %v3489_v29, %v4263_v11  ;;  %3510 = vpow2.f32 %v2744_v25  ;;  %v1433_v3 = vpop.f32.mrb[67].mxu1  ;;  %v4362_v24 = vadd.f32 %v4141_v63, %v1431_v43 }
 0x19b   :  { %v3493_v4 = vpop.eup %3492  ;;  %v2224_v15 = vmul.f32 %v3491_v13, %v4266_v16  ;;  %3512 = vpow2.f32 %v2747_v44  ;;  %v1434_v23 = vadd.f32 %v1433_v3, %v1144_v5 }
 0x19c   :  { %v3495_v17 = vpop.eup %3494  ;;  %v2956_v41 = vpack.c.bf16 %v2226_v60, %v2225_v0  ;;  %v2041_v53 = vadd.f32 1.0, %v3493_v4  ;;  %3514 = vpow2.f32 %v2745_v51  ;;  %v2748_v49 = vmul.f32 -1.442695, %v4362_v24  ;;  %v1149_v47 = vpop.f32.mrb[68].mxu0 }
 0x19d   :  { %v3497_v27 = vpop.eup %3496  ;;  %v2951_v57 = vpack.c.bf16 %v2224_v15, %v2223_v7  ;;  %v2039_v11 = vadd.f32 1.0, %v3495_v17  ;;  %v4365_v61 = vadd.f32 %v4141_v63, %v1434_v23  ;;  %v4375_v44 = vpop.f32.mrb[68].mxu1  ;;  %v1439_v20 = vadd.f32 %v3189_v36, %v1149_v47 }
 0x19e   :  { %v3499_v55 = vpop.eup %3498  ;;  %3076 = vst [vmem:[%s4659_s3 + $0x48] sm:$0xff] %v2956_v41   ;;  %3516 = vrcp.f32 %v2041_v53  ;;  %v2042_v16 = vadd.f32 1.0, %v3497_v27  ;;  %v1151_v32 = vpop.f32.mrb[69].mxu0 }
 0x19f   :  { %v3501_v12 = vpop.eup %3500  ;;  %3075 = vst [vmem:[%s4659_s3 + $0x40] sm:$0xff] %v2951_v57   ;;  %3518 = vrcp.f32 %v2039_v11  ;;  %v2040_v25 = vadd.f32 1.0, %v3499_v55  ;;  %v2749_v31 = vmul.f32 -1.442695, %v4365_v61  ;;  %v1446_v9 = vpop.f32.mrb[69].mxu1  ;;  %v4382_v60 = vadd.f32 %v4141_v63, %v1439_v20 }
 0x1a0   :  { %v3503_v37 = vpop.eup %3502  ;;  %3520 = vrcp.f32 %v2042_v16  ;;  %v2229_v0 = vmul.f32 %v3501_v12, %v4277_v21  ;;  %v1152_v43 = vpop.f32.mrb[70].mxu0 }
 0x1a1   :  { %v3505_v29 = vpop.eup %3504  ;;  %3522 = vrcp.f32 %v2040_v25  ;;  %v4378_v5 = vpop.f32.mrb[70].mxu1  ;;  %v1442_v51 = vadd.f32 %v3190_v56, %v1152_v43  ;;  %v2227_v4 = vmul.f32 %v3503_v37, %v4280_v52  ;;  %v2750_v52 = vmul.f32 -1.442695, %v4382_v60 }
 0x1a2   :  { %v3507_v13 = vpop.eup %3506  ;;  %v2230_v7 = vmul.f32 %v3505_v29, %v4293_v35  ;;  %3524 = vpow2.f32 %v2748_v49  ;;  %v1154_v39 = vpop.f32.mrb[71].mxu0 }
 0x1a3   :  { %v1449_v3 = vpop.f32.mrb[71].mxu1  ;;  %v3509_v36 = vpop.eup %3508  ;;  %v2228_v15 = vmul.f32 %v3507_v13, %v4297_v19  ;;  %3526 = vpow2.f32 %v2749_v31  ;;  %v4387_v41 = vadd.f32 %v4141_v63, %v1442_v51 }
 0x1a4   :  { %v3511_v21 = vpop.eup %3510  ;;  %v2966_v23 = vpack.c.bf16 %v2230_v7, %v2229_v0  ;;  %v2045_v17 = vadd.f32 1.0, %v3509_v36  ;;  %v1157_v55 = vpop.f32.mrb[72].mxu0 }
 0x1a5   :  { %v3513_v35 = vpop.eup %3512  ;;  %v2961_v53 = vpack.c.bf16 %v2228_v15, %v2227_v4  ;;  %v2043_v27 = vadd.f32 1.0, %v3511_v21  ;;  %v2751_v11 = vmul.f32 -1.442695, %v4387_v41  ;;  %v4397_v16 = vpop.f32.mrb[72].mxu1  ;;  %v1447_v12 = vadd.f32 %v1446_v9, %v1157_v55 }
 0x1a6   :  { %v3515_v57 = vpop.eup %3514  ;;  %3078 = vst [vmem:[%s4659_s3 + $0x58] sm:$0xff] %v2966_v23   ;;  %3528 = vrcp.f32 %v2045_v17  ;;  %v2046_v56 = vadd.f32 1.0, %v3513_v35  ;;  %v1159_v25 = vpop.f32.mrb[73].mxu0 }
 0x1a7   :  { %3077 = vst [vmem:[%s4659_s3 + $0x50] sm:$0xff] %v2961_v53   ;;  %3530 = vrcp.f32 %v2043_v27  ;;  %v2044_v19 = vadd.f32 1.0, %v3515_v57  ;;  %v4399_v31 = vpop.f32.mrb[73].mxu1  ;;  %v1160_v37 = vpop.f32.mrb[74].mxu0  ;;  %v4404_v29 = vadd.f32 %v4141_v63, %v1447_v12 }
 0x1a8   :  { %v3517_v49 = vpop.eup %3516  ;;  %3532 = vrcp.f32 %v2046_v56  ;;  %v4401_v20 = vpop.f32.mrb[74].mxu1  ;;  %v1450_v0 = vadd.f32 %v1449_v3, %v1160_v37 }
 0x1a9   :  { %v3519_v47 = vpop.eup %3518  ;;  %3534 = vrcp.f32 %v2044_v19  ;;  %v1162_v43 = vpop.f32.mrb[75].mxu0  ;;  %v2233_v9 = vmul.f32 %v3517_v49, %v4308_v45  ;;  %v2752_v15 = vmul.f32 -1.442695, %v4404_v29 }
 0x1aa   :  { %v3521_v32 = vpop.eup %3520  ;;  %3536 = vpow2.f32 %v2750_v52  ;;  %v4406_v13 = vpop.f32.mrb[75].mxu1  ;;  %v2231_v36 = vmul.f32 %v3519_v47, %v4311_v40  ;;  %v4414_v21 = vadd.f32 %v4141_v63, %v1450_v0 }
 0x1ab   :  { %v3523_v7 = vpop.eup %3522  ;;  %v2234_v51 = vmul.f32 %v3521_v32, %v4314_v8  ;;  %3538 = vpow2.f32 %v2751_v11 }
 0x1ac   :  { %v3525_v39 = vpop.eup %3524  ;;  %v2232_v4 = vmul.f32 %v3523_v7, %v4327_v1  ;;  %3540 = vpow2.f32 %v2752_v15  ;;  %v2753_v45 = vmul.f32 -1.442695, %v4414_v21  ;;  %v1165_v40 = vpop.f32.mrb[76].mxu0 }
 0x1ad   :  { %v3527_v3 = vpop.eup %3526  ;;  %v2976_v23 = vpack.c.bf16 %v2234_v51, %v2233_v9  ;;  %v2047_v17 = vadd.f32 1.0, %v3525_v39  ;;  %v4420_v8 = vpop.f32.mrb[76].mxu1  ;;  %v1455_v27 = vadd.f32 %v4375_v44, %v1165_v40 }
 0x1ae   :  { %v2971_v35 = vpack.c.bf16 %v2232_v4, %v2231_v36  ;;  %v2048_v53 = vadd.f32 1.0, %v3527_v3  ;;  %v1167_v57 = vpop.f32.mrb[77].mxu0  ;;  %v4426_v56 = vpop.f32.mrb[77].mxu1 }
 0x1af   :  { %3080 = vst [vmem:[%s4659_s3 + $0x68] sm:$0xff] %v2976_v23   ;;  %3542 = vrcp.f32 %v2047_v17  ;;  %v1168_v19 = vpop.f32.mrb[78].mxu0  ;;  %v4428_v11 = vpop.f32.mrb[78].mxu1  ;;  %v4431_v49 = vadd.f32 %v4141_v63, %v1455_v27 }
 0x1b0   :  { %v3529_v1 = vpop.eup %3528  ;;  %3079 = vst [vmem:[%s4659_s3 + $0x60] sm:$0xff] %v2971_v35   ;;  %3544 = vrcp.f32 %v2048_v53  ;;  %v1458_v12 = vadd.f32 %v4378_v5, %v1168_v19  ;;  %v1170_v25 = vpop.f32.mrb[79].mxu0 }
 0x1b1   :  { %v3531_v52 = vpop.eup %3530  ;;  %3546 = vpow2.f32 %v2753_v45  ;;  %v4434_v47 = vpop.f32.mrb[79].mxu1  ;;  %v2237_v44 = vmul.f32 %v3529_v1, %v4335_v28  ;;  %v2754_v9 = vmul.f32 -1.442695, %v4431_v49 }
 0x1b2   :  { %v3533_v55 = vpop.eup %3532  ;;  %v2235_v43 = vmul.f32 %v3531_v52, %v4338_v48  ;;  %v4442_v51 = vadd.f32 %v4141_v63, %v1458_v12 }
 0x1b3   :  { %v3535_v37 = vpop.eup %3534  ;;  %v2238_v32 = vmul.f32 %v3533_v55, %v4345_v33  ;;  %3548 = vpow2.f32 %v2754_v9 }
 0x1b4   :  { %v3537_v0 = vpop.eup %3536  ;;  %v2236_v7 = vmul.f32 %v3535_v37, %v4354_v59  ;;  %v2755_v28 = vmul.f32 -1.442695, %v4442_v51  ;;  %v1173_v48 = vpop.f32.mrb[80].mxu0 }
 0x1b5   :  { %v3539_v39 = vpop.eup %3538  ;;  %v2986_v5 = vpack.c.bf16 %v2238_v32, %v2237_v44  ;;  %v2049_v36 = vadd.f32 1.0, %v3537_v0  ;;  %v3205_v33 = vpop.f32.mrb[80].mxu1  ;;  %v1463_v3 = vadd.f32 %v4399_v31, %v1173_v48 }
 0x1b6   :  { %v2981_v4 = vpack.c.bf16 %v2236_v7, %v2235_v43  ;;  %v2050_v15 = vadd.f32 1.0, %v3539_v39  ;;  %v3541_v59 = vpop.eup %3540  ;;  %v1503_v23 = vadd.f32 %v3205_v33, %v4082_v2  ;;  %v1175_v17 = vpop.f32.mrb[81].mxu0 }
 0x1b7   :  { %3082 = vst [vmem:[%s4659_s3 + $0x78] sm:$0xff] %v2986_v5   ;;  %3550 = vrcp.f32 %v2049_v36  ;;  %v1494_v35 = vpop.f32.mrb[81].mxu1  ;;  %v2051_v45 = vadd.f32 1.0, %v3541_v59  ;;  %v1176_v1 = vpop.f32.mrb[82].mxu0  ;;  %v4456_v19 = vadd.f32 %v4141_v63, %v1463_v3 }
 0x1b8   :  { %3081 = vst [vmem:[%s4659_s3 + $0x70] sm:$0xff] %v2981_v4   ;;  %3552 = vrcp.f32 %v2050_v15  ;;  %v1495_v40 = vadd.f32 %v1494_v35, %v4076_v58  ;;  %v3206_v27 = vpop.f32.mrb[82].mxu1  ;;  %v4459_v55 = vadd.f32 %v4141_v63, %v1503_v23  ;;  %v1466_v2 = vadd.f32 %v4406_v13, %v1176_v1  ;;  %v1178_v31 = vpop.f32.mrb[83].mxu0 }
 0x1b9   :  { %v3543_v53 = vpop.eup %3542  ;;  %3554 = vpow2.f32 %v2755_v28  ;;  %v1497_v12 = vpop.f32.mrb[83].mxu1  ;;  %v1506_v44 = vadd.f32 %v3206_v27, %v4086_v6  ;;  %v2756_v32 = vmul.f32 -1.442695, %v4456_v19 }
 0x1ba   :  { %v3545_v57 = vpop.eup %3544  ;;  %v2239_v52 = vmul.f32 %v3543_v53, %v4362_v24  ;;  %3556 = vrcp.f32 %v2051_v45  ;;  %v4464_v58 = vadd.f32 %v4141_v63, %v1495_v40  ;;  %v2766_v0 = vmul.f32 -1.442695, %v4459_v55 }
 0x1bb   :  { %v3547_v25 = vpop.eup %3546  ;;  %v2240_v37 = vmul.f32 %v3545_v57, %v4365_v61  ;;  %v4470_v43 = vadd.f32 %v4141_v63, %v1466_v2  ;;  %v4474_v9 = vadd.f32 %v4141_v63, %v1506_v44  ;;  %v1498_v61 = vadd.f32 %v1497_v12, %v4080_v62 }
 0x1bc   :  { %v2052_v24 = vadd.f32 1.0, %v3547_v25  ;;  %v2764_v7 = vmul.f32 -1.442695, %v4464_v58  ;;  %v1181_v5 = vpop.f32.mrb[84].mxu0  ;;  %v3209_v36 = vpop.f32.mrb[84].mxu1 }
 0x1bd   :  { %v2991_v13 = vpack.c.bf16 %v2240_v37, %v2239_v52  ;;  %v2757_v39 = vmul.f32 -1.442695, %v4470_v43  ;;  %v4482_v6 = vadd.f32 %v4141_v63, %v1498_v61  ;;  %v3549_v4 = vpop.eup %3548  ;;  %v2767_v15 = vmul.f32 -1.442695, %v4474_v9  ;;  %v1183_v48 = vpop.f32.mrb[85].mxu0 }
 0x1be   :  { %3558 = vrcp.f32 %v2052_v24  ;;  %v1471_v28 = vadd.f32 %v4397_v16, %v1181_v5  ;;  %v1519_v62 = vadd.f32 %v3209_v36, %v4098_v18  ;;  %v1510_v33 = vpop.f32.mrb[85].mxu1  ;;  %v2053_v3 = vadd.f32 1.0, %v3549_v4  ;;  %v1184_v17 = vpop.f32.mrb[86].mxu0  ;;  %v4493_v16 = vld [vmem:[%s4658_s2] ss:$0 sm:$0xff] }
 0x1bf   :  { %3083 = vst [vmem:[%s4659_s3 + $0x80] sm:$0xff] %v2991_v13   ;;  %3560 = vpow2.f32 %v2756_v32  ;;  %v2765_v23 = vmul.f32 -1.442695, %v4482_v6  ;;  %v1511_v63 = vadd.f32 %v1510_v33, %v4090_v10  ;;  %v3210_v35 = vpop.f32.mrb[86].mxu1  ;;  %v1186_v1 = vpop.f32.mrb[87].mxu0  ;;  %v1474_v52 = vadd.f32 %v4401_v20, %v1184_v17 }
 0x1c0   :  { %3562 = vpow2.f32 %v2766_v0  ;;  %v4496_v18 = vadd.f32 %v4493_v16, %v1471_v28  ;;  %v4499_v40 = vadd.f32 %v4493_v16, %v1519_v62  ;;  %v1513_v27 = vpop.f32.mrb[87].mxu1 }
 0x1c1   :  { %v3551_v59 = vpop.eup %3550  ;;  %3564 = vpow2.f32 %v2764_v7  ;;  %v4510_v24 = vadd.f32 %v4493_v16, %v1474_v52  ;;  %v1514_v32 = vadd.f32 %v1513_v27, %v4094_v14 }
 0x1c2   :  { %v3553_v53 = vpop.eup %3552  ;;  %v2241_v45 = vmul.f32 %v3551_v59, %v4382_v60  ;;  %3566 = vpow2.f32 %v2757_v39  ;;  %v4503_v60 = vadd.f32 %v4493_v16, %v1511_v63  ;;  %v2758_v31 = vmul.f32 -1.442695, %v4496_v18 }
 0x1c3   :  { %v3555_v10 = vpop.eup %3554  ;;  %v2242_v57 = vmul.f32 %v3553_v53, %v4387_v41  ;;  %3568 = vrcp.f32 %v2053_v3  ;;  %v2770_v12 = vmul.f32 -1.442695, %v4499_v40  ;;  %v1522_v41 = vadd.f32 %v3210_v35, %v4102_v22 }
 0x1c4   :  { %v2054_v2 = vadd.f32 1.0, %v3555_v10  ;;  %3570 = vpow2.f32 %v2767_v15  ;;  %v3557_v25 = vpop.eup %3556  ;;  %v2768_v44 = vmul.f32 -1.442695, %v4503_v60  ;;  %v2759_v20 = vmul.f32 -1.442695, %v4510_v24  ;;  %v1189_v0 = vpop.f32.mrb[88].mxu0 }
 0x1c5   :  { %v2996_v37 = vpack.c.bf16 %v2242_v57, %v2241_v45  ;;  %3572 = vpow2.f32 %v2765_v23  ;;  %v3213_v13 = vpop.f32.mrb[88].mxu1  ;;  %v2243_v61 = vmul.f32 %v3557_v25, %v4404_v29  ;;  %v4520_v39 = vadd.f32 %v4493_v16, %v1522_v41  ;;  %v1191_v5 = vpop.f32.mrb[89].mxu0 }
 0x1c6   :  { %3574 = vrcp.f32 %v2054_v2  ;;  %v1479_v22 = vadd.f32 %v4426_v56, %v1189_v0  ;;  %v1526_v14 = vpop.f32.mrb[89].mxu1  ;;  %v1535_v15 = vadd.f32 %v3213_v13, %v4114_v34  ;;  %v1192_v62 = vpop.f32.mrb[90].mxu0  ;;  %v4527_v59 = vadd.f32 %v4493_v16, %v1514_v32 }
 0x1c7   :  { %3084 = vst [vmem:[%s4659_s3 + $0x88] sm:$0xff] %v2996_v37   ;;  %3576 = vpow2.f32 %v2758_v31  ;;  %v1527_v28 = vadd.f32 %v1526_v14, %v4106_v26  ;;  %v3214_v48 = vpop.f32.mrb[90].mxu1  ;;  %v1194_v3 = vpop.f32.mrb[91].mxu0  ;;  %v2771_v17 = vmul.f32 -1.442695, %v4520_v39  ;;  %v1482_v53 = vadd.f32 %v4434_v47, %v1192_v62 }
 0x1c8   :  { %v3559_v7 = vpop.eup %3558  ;;  %3578 = vpow2.f32 %v2770_v12  ;;  %v4531_v26 = vadd.f32 %v4493_v16, %v1479_v22  ;;  %v4538_v27 = vadd.f32 %v4493_v16, %v1535_v15  ;;  %v2769_v57 = vmul.f32 -1.442695, %v4527_v59 }
 0x1c9   :  { %v3561_v36 = vpop.eup %3560  ;;  %v2244_v4 = vmul.f32 %v3559_v7, %v4414_v21  ;;  %3580 = vpow2.f32 %v2768_v44  ;;  %v1529_v21 = vpop.f32.mrb[91].mxu1  ;;  %v4542_v52 = vadd.f32 %v4493_v16, %v1527_v28  ;;  %v1538_v31 = vadd.f32 %v3214_v48, %v4118_v38 }
 0x1ca   :  { %v3563_v33 = vpop.eup %3562  ;;  %v2055_v29 = vadd.f32 1.0, %v3561_v36  ;;  %3582 = vpow2.f32 %v2759_v20  ;;  %v1530_v12 = vadd.f32 %v1529_v21, %v4110_v30  ;;  %v2760_v32 = vmul.f32 -1.442695, %v4531_v26 }
 0x1cb   :  { %v3565_v56 = vpop.eup %3564  ;;  %v3001_v23 = vpack.c.bf16 %v2244_v4, %v2243_v61  ;;  %v2065_v63 = vadd.f32 1.0, %v3563_v33  ;;  %v2774_v38 = vmul.f32 -1.442695, %v4538_v27  ;;  %v2772_v4 = vmul.f32 -1.442695, %v4542_v52 }
 0x1cc   :  { %v3567_v35 = vpop.eup %3566  ;;  %3584 = vrcp.f32 %v2055_v29  ;;  %v2063_v34 = vadd.f32 1.0, %v3565_v56  ;;  %v1197_v25 = vpop.f32.mrb[92].mxu0  ;;  %v4557_v3 = vadd.f32 %v4493_v16, %v1538_v31  ;;  %v4560_v56 = vadd.f32 %v4493_v16, %v1530_v12 }
 0x1cd   :  { %v3569_v45 = vpop.eup %3568  ;;  %3085 = vst [vmem:[%s4659_s3 + $0x90] sm:$0xff] %v3001_v23   ;;  %3586 = vrcp.f32 %v2065_v63  ;;  %v2056_v1 = vadd.f32 1.0, %v3567_v35  ;;  %v3217_v37 = vpop.f32.mrb[92].mxu1  ;;  %v1487_v20 = vadd.f32 %v4420_v8, %v1197_v25 }
 0x1ce   :  { %v3571_v10 = vpop.eup %3570  ;;  %3588 = vrcp.f32 %v2063_v34  ;;  %v1199_v0 = vpop.f32.mrb[93].mxu0  ;;  %v2245_v61 = vmul.f32 %v3569_v45, %v4431_v49  ;;  %v1551_v15 = vadd.f32 %v3217_v37, %v4130_v50  ;;  %v4554_v49 = vadd.f32 %v4493_v16, %v1482_v53 }
 0x1cf   :  { %v3573_v2 = vpop.eup %3572  ;;  %3590 = vrcp.f32 %v2056_v1  ;;  %v2066_v47 = vadd.f32 1.0, %v3571_v10  ;;  %v1542_v13 = vpop.f32.mrb[93].mxu1  ;;  %v4566_v23 = vadd.f32 %v4493_v16, %v1487_v20  ;;  %v2775_v10 = vmul.f32 -1.442695, %v4557_v3 }
 0x1d0   :  { %v3575_v44 = vpop.eup %3574  ;;  %v2064_v41 = vadd.f32 1.0, %v3573_v2  ;;  %3592 = vpow2.f32 %v2771_v17  ;;  %v1200_v30 = vpop.f32.mrb[94].mxu0  ;;  %v1543_v63 = vadd.f32 %v1542_v13, %v4122_v42  ;;  %v2761_v45 = vmul.f32 -1.442695, %v4554_v49 }
 0x1d1   :  { %v3577_v7 = vpop.eup %3576  ;;  %v2246_v22 = vmul.f32 %v3575_v44, %v4442_v51  ;;  %3594 = vrcp.f32 %v2066_v47  ;;  %v3218_v5 = vpop.f32.mrb[94].mxu1  ;;  %v1490_v21 = vadd.f32 %v4428_v11, %v1200_v30  ;;  %v2773_v42 = vmul.f32 -1.442695, %v4560_v56 }
 0x1d2   :  { %v3579_v14 = vpop.eup %3578  ;;  %3596 = vrcp.f32 %v2064_v41  ;;  %v2057_v36 = vadd.f32 1.0, %v3577_v7  ;;  %v1202_v8 = vpop.f32.mrb[95].mxu0  ;;  %v1554_v35 = vadd.f32 %v3218_v5, %v4134_v54  ;;  %v2762_v2 = vmul.f32 -1.442695, %v4566_v23 }
 0x1d3   :  { %v1545_v28 = vpop.f32.mrb[95].mxu1  ;;  %v3581_v62 = vpop.eup %3580  ;;  %v3006_v48 = vpack.c.bf16 %v2246_v22, %v2245_v61  ;;  %v2069_v33 = vadd.f32 1.0, %v3579_v14  ;;  %3598 = vpow2.f32 %v2769_v57  ;;  %v4577_v11 = vadd.f32 %v4493_v16, %v1551_v15 }
 0x1d4   :  { %v3583_v51 = vpop.eup %3582  ;;  %3600 = vrcp.f32 %v2057_v36  ;;  %v2067_v29 = vadd.f32 1.0, %v3581_v62  ;;  %v1546_v34 = vadd.f32 %v1545_v28, %v4126_v46  ;;  %v4582_v31 = vadd.f32 %v4493_v16, %v1543_v63 }
 0x1d5   :  { %3086 = vst [vmem:[%s4659_s3 + $0x98] sm:$0xff] %v3006_v48   ;;  %3602 = vrcp.f32 %v2069_v33  ;;  %v2058_v50 = vadd.f32 1.0, %v3583_v51  ;;  %v4586_v44 = vadd.f32 %v4493_v16, %v1490_v21 }
 0x1d6   :  { %v3585_v17 = vpop.eup %3584  ;;  %3604 = vrcp.f32 %v2067_v29  ;;  %v4610_v8 = vadd.f32 %v4493_v16, %v1546_v34 }
 0x1d7   :  { %v3587_v53 = vpop.eup %3586  ;;  %3606 = vrcp.f32 %v2058_v50  ;;  %v2247_v46 = vmul.f32 %v3585_v17, %v4456_v19  ;;  %v4590_v19 = vadd.f32 %v4493_v16, %v1554_v35 }
 0x1d8   :  { %v3589_v1 = vpop.eup %3588  ;;  %3608 = vpow2.f32 %v2760_v32  ;;  %v2257_v25 = vmul.f32 %v3587_v53, %v4459_v55  ;;  %v2778_v55 = vmul.f32 -1.442695, %v4577_v11  ;;  %v2777_v16 = vmul.f32 -1.442695, %v4610_v8 }
 0x1d9   :  { %v3591_v57 = vpop.eup %3590  ;;  %3610 = vpow2.f32 %v2774_v38  ;;  %v2255_v0 = vmul.f32 %v3589_v1, %v4464_v58  ;;  %v2763_v58 = vmul.f32 -1.442695, %v4586_v44 }
 0x1da   :  { %v3593_v54 = vpop.eup %3592  ;;  %v2248_v47 = vmul.f32 %v3591_v57, %v4470_v43  ;;  %3612 = vpow2.f32 %v2772_v4 }
 0x1db   :  { %v3595_v12 = vpop.eup %3594  ;;  %v2070_v37 = vadd.f32 1.0, %v3593_v54  ;;  %3614 = vpow2.f32 %v2761_v45 }
 0x1dc   :  { %v3597_v41 = vpop.eup %3596  ;;  %v3011_v32 = vpack.c.bf16 %v2248_v47, %v2247_v46  ;;  %v2258_v20 = vmul.f32 %v3595_v12, %v4474_v9  ;;  %3616 = vpow2.f32 %v2775_v10  ;;  %v2776_v9 = vmul.f32 -1.442695, %v4582_v31 }
 0x1dd   :  { %v3599_v43 = vpop.eup %3598  ;;  %v2256_v13 = vmul.f32 %v3597_v41, %v4482_v6  ;;  %3618 = vrcp.f32 %v2070_v37  ;;  %v2779_v6 = vmul.f32 -1.442695, %v4590_v19 }
 0x1de   :  { %v3601_v7 = vpop.eup %3600  ;;  %3087 = vst [vmem:[%s4659_s3 + $0xa0] sm:$0xff] %v3011_v32   ;;  %v3036_v61 = vpack.c.bf16 %v2258_v20, %v2257_v25  ;;  %v2068_v22 = vadd.f32 1.0, %v3599_v43  ;;  %3620 = vpow2.f32 %v2773_v42 }
 0x1df   :  { %v3603_v38 = vpop.eup %3602  ;;  %v3031_v30 = vpack.c.bf16 %v2256_v13, %v2255_v0  ;;  %3622 = vpow2.f32 %v2762_v2  ;;  %v2249_v4 = vmul.f32 %v3601_v7, %v4496_v18 }
 0x1e0   :  { %v3605_v5 = vpop.eup %3604  ;;  %3092 = vst [vmem:[%s4659_s3 + $0xc8] sm:$0xff] %v3036_v61   ;;  %3624 = vrcp.f32 %v2068_v22  ;;  %v2261_v35 = vmul.f32 %v3603_v38, %v4499_v40 }
 0x1e1   :  { %v3607_v14 = vpop.eup %3606  ;;  %3091 = vst [vmem:[%s4659_s3 + $0xc0] sm:$0xff] %v3031_v30   ;;  %3626 = vpow2.f32 %v2778_v55  ;;  %v2259_v2 = vmul.f32 %v3605_v5, %v4503_v60 }
 0x1e2   :  { %v3609_v36 = vpop.eup %3608  ;;  %v2250_v15 = vmul.f32 %v3607_v14, %v4510_v24  ;;  %3628 = vpow2.f32 %v2776_v9 }
 0x1e3   :  { %v3611_v28 = vpop.eup %3610  ;;  %v2059_v62 = vadd.f32 1.0, %v3609_v36  ;;  %3630 = vpow2.f32 %v2763_v58 }
 0x1e4   :  { %v3613_v48 = vpop.eup %3612  ;;  %v3016_v33 = vpack.c.bf16 %v2250_v15, %v2249_v4  ;;  %v2073_v51 = vadd.f32 1.0, %v3611_v28  ;;  %3632 = vpow2.f32 %v2779_v6 }
 0x1e5   :  { %v3615_v29 = vpop.eup %3614  ;;  %3634 = vrcp.f32 %v2059_v62  ;;  %v2071_v50 = vadd.f32 1.0, %v3613_v48 }
 0x1e6   :  { %v3617_v63 = vpop.eup %3616  ;;  %3088 = vst [vmem:[%s4659_s3 + $0xa8] sm:$0xff] %v3016_v33   ;;  %3636 = vrcp.f32 %v2073_v51  ;;  %v2060_v18 = vadd.f32 1.0, %v3615_v29 }
 0x1e7   :  { %v3619_v24 = vpop.eup %3618  ;;  %3638 = vrcp.f32 %v2071_v50  ;;  %v2074_v17 = vadd.f32 1.0, %v3617_v63 }
 0x1e8   :  { %v3621_v21 = vpop.eup %3620  ;;  %v2262_v34 = vmul.f32 %v3619_v24, %v4520_v39  ;;  %3640 = vrcp.f32 %v2060_v18 }
 0x1e9   :  { %v3623_v53 = vpop.eup %3622  ;;  %3642 = vrcp.f32 %v2074_v17  ;;  %v2072_v45 = vadd.f32 1.0, %v3621_v21 }
 0x1ea   :  { %v3625_v1 = vpop.eup %3624  ;;  %v3046_v10 = vpack.c.bf16 %v2262_v34, %v2261_v35  ;;  %v2061_v57 = vadd.f32 1.0, %v3623_v53  ;;  %3644 = vpow2.f32 %v2777_v16 }
 0x1eb   :  { %v3627_v42 = vpop.eup %3626  ;;  %v2260_v54 = vmul.f32 %v3625_v1, %v4527_v59  ;;  %3646 = vrcp.f32 %v2072_v45 }
 0x1ec   :  { %v3629_v46 = vpop.eup %3628  ;;  %3094 = vst [vmem:[%s4659_s3 + $0xd8] sm:$0xff] %v3046_v10   ;;  %v2077_v40 = vadd.f32 1.0, %v3627_v42  ;;  %3648 = vrcp.f32 %v2061_v57 }
 0x1ed   :  { %v3631_v39 = vpop.eup %3630  ;;  %v3041_v47 = vpack.c.bf16 %v2260_v54, %v2259_v2  ;;  %v2075_v32 = vadd.f32 1.0, %v3629_v46 }
 0x1ee   :  { %v3633_v12 = vpop.eup %3632  ;;  %v2062_v25 = vadd.f32 1.0, %v3631_v39  ;;  %3650 = vrcp.f32 %v2077_v40 }
 0x1ef   :  { %v3635_v37 = vpop.eup %3634  ;;  %3093 = vst [vmem:[%s4659_s3 + $0xd0] sm:$0xff] %v3041_v47   ;;  %v2078_v60 = vadd.f32 1.0, %v3633_v12 }
 0x1f0   :  { %v3637_v59 = vpop.eup %3636  ;;  %3652 = vrcp.f32 %v2062_v25  ;;  %v2251_v0 = vmul.f32 %v3635_v37, %v4531_v26 }
 0x1f1   :  { %v3639_v41 = vpop.eup %3638  ;;  %3654 = vrcp.f32 %v2078_v60  ;;  %v2265_v7 = vmul.f32 %v3637_v59, %v4538_v27 }
 0x1f2   :  { %v3641_v20 = vpop.eup %3640  ;;  %3656 = vrcp.f32 %v2075_v32  ;;  %v2263_v30 = vmul.f32 %v3639_v41, %v4542_v52 }
 0x1f3   :  { %v3643_v43 = vpop.eup %3642  ;;  %v2252_v13 = vmul.f32 %v3641_v20, %v4554_v49 }
 0x1f4   :  { %v3645_v55 = vpop.eup %3644  ;;  %v2266_v61 = vmul.f32 %v3643_v43, %v4557_v3 }
 0x1f5   :  { %v3647_v22 = vpop.eup %3646  ;;  %v3021_v9 = vpack.c.bf16 %v2252_v13, %v2251_v0  ;;  %v2076_v38 = vadd.f32 1.0, %v3645_v55 }
 0x1f6   :  { %v3056_v58 = vpack.c.bf16 %v2266_v61, %v2265_v7  ;;  %v2264_v5 = vmul.f32 %v3647_v22, %v4560_v56  ;;  %v3649_v26 = vpop.eup %3648 }
 0x1f7   :  { %3089 = vst [vmem:[%s4659_s3 + $0xb0] sm:$0xff] %v3021_v9   ;;  %3658 = vrcp.f32 %v2076_v38  ;;  %v2253_v56 = vmul.f32 %v3649_v26, %v4566_v23 }
 0x1f8   :  { %3096 = vst [vmem:[%s4659_s3 + $0xe8] sm:$0xff] %v3056_v58   ;;  %v3051_v27 = vpack.c.bf16 %v2264_v5, %v2263_v30  ;;  %v3651_v49 = vpop.eup %3650 }
 0x1f9   :  { %v2269_v14 = vmul.f32 %v3651_v49, %v4577_v11 }
 0x1fa   :  { %v3653_v3 = vpop.eup %3652  ;;  %3095 = vst [vmem:[%s4659_s3 + $0xe0] sm:$0xff] %v3051_v27  }
 0x1fb   :  { %v3655_v52 = vpop.eup %3654  ;;  %v2254_v6 = vmul.f32 %v3653_v3, %v4586_v44 }
 0x1fc   :  { %v2270_v36 = vmul.f32 %v3655_v52, %v4590_v19  ;;  %v3657_v28 = vpop.eup %3656 }
 0x1fd   :  { %v3026_v4 = vpack.c.bf16 %v2254_v6, %v2253_v56  ;;  %v2267_v23 = vmul.f32 %v3657_v28, %v4582_v31 }
 0x1fe   :  { %v3066_v15 = vpack.c.bf16 %v2270_v36, %v2269_v14 }
 0x1ff   :  { %3090 = vst [vmem:[%s4659_s3 + $0xb8] sm:$0xff] %v3026_v4  }
 0x200   :  { %3098 = vst [vmem:[%s4659_s3 + $0xf8] sm:$0xff] %v3066_v15  }
 0x201   :  { %v3659_v62 = vpop.eup %3658 }
 0x202   :  { %v2268_v44 = vmul.f32 %v3659_v62, %v4610_v8 }
 0x204   :  { %v3061_v48 = vpack.c.bf16 %v2268_v44, %v2267_v23 }
 0x206   :  { %3097 = vst [vmem:[%s4659_s3 + $0xf0] sm:$0xff] %v3061_v48  }

</bundles_post_ra>
